<compile_context>
chip_gen: v7x
topology: tpu7x:2x2x1
jax: 0.10.0
libtpu: 0.0.40
codegen_flags: <defaults>
</compile_context>

<pallas_src>
import functools
import numpy as np

import jax
import jax.numpy as jnp
from jax import lax
from jax.experimental import pallas as pl
from jax.experimental.pallas import tpu as pltpu


# ----------------------------- in-kernel math helpers -----------------------------

def _recip(x):
    # EUP approximate reciprocal + one Newton-Raphson refinement (~1e-8 relative error):
    # keeps the divide off the VALU without risking the 2e-3 reference tolerance.
    r = pl.reciprocal(x, approx=True)
    return r * (2.0 - x * r)


def _erf(x):
    # Abramowitz & Stegun 7.1.26 rational approximation, |abs err| < 1.5e-7.
    p = 0.3275911
    a1, a2, a3, a4, a5 = 0.254829592, -0.284496736, 1.421413741, -1.453152027, 1.061405429
    z = jnp.abs(x)
    t = _recip(1.0 + p * z)
    poly = ((((a5 * t + a4) * t + a3) * t + a2) * t + a1) * t
    e = 1.0 - poly * jnp.exp(-z * z)
    return jnp.where(x >= 0, e, -e)


def _gelu(x):
    # exact (erf-based) GELU, matching torch.nn.GELU() default
    return 0.5 * x * (1.0 + _erf(x * (1.0 / np.sqrt(2.0))))


# ----------------------------------- kernel ---------------------------------------

def elgca_kernel(x1_ref, x2_ref, wdw_ref, bdw_ref, wq_ref, bq_ref,
                 pavg_ref, pmax_ref, o_ref, xpad_ref, *, heads, H, W):
    HW = H * W
    HoWo = (H // 2) * (W // 2)
    Lp = HW + 2 * W + 2
    Bb = x2_ref.shape[0]
    Ch = x2_ref.shape[1]
    Cq = wq_ref.shape[0] // heads
    C = o_ref.shape[1]

    # -------- branch 1: depthwise 3x3 conv (padding=1) + GELU, Bb images on sublanes --------
    # Pad x1 into a VMEM scratch (one zero row above/below + one lane each side); this replaces
    # the wrapper-side jnp.pad and its extra HBM write+read of half the input.
    zpad = jnp.zeros((Bb * Ch, W + 1), jnp.float32)
    xpad_ref[:, 0:W + 1] = zpad
    xpad_ref[:, W + 1 + HW:Lp] = zpad
    xpad_ref[:, W + 1:W + 1 + HW] = x1_ref[...]
    x1p = xpad_ref[...]                               # (Bb*Ch, Lp)

    # lane-index masks for the W borders (dx=0 / dx=2 taps wrap through the flat layout)
    lane = lax.broadcasted_iota(jnp.int32, (1, HW), 1)
    w_idx = lane % W
    mask_l = jnp.where(w_idx > 0, 1.0, 0.0)           # zero where w == 0
    mask_r = jnp.where(w_idx < W - 1, 1.0, 0.0)       # zero where w == W-1

    wdw = wdw_ref[...]                                # (Bb*Ch, 9), tap t = 3*dy + dx
    acc = jnp.zeros((Bb * Ch, HW), jnp.float32)
    for dx in range(3):                               # group by dx -> one mask mul per group
        g = (x1p[:, dx:dx + HW] * wdw[:, dx:dx + 1]
             + x1p[:, W + dx:W + dx + HW] * wdw[:, 3 + dx:4 + dx]
             + x1p[:, 2 * W + dx:2 * W + dx + HW] * wdw[:, 6 + dx:7 + dx])
        if dx == 0:
            g = g * mask_l
        elif dx == 2:
            g = g * mask_r
        acc = acc + g
    y1 = _gelu(acc + bdw_ref[...])                    # (Bb*Ch, HW)

    # store the depthwise half right away -> short y1 live range (no spills at large Bb)
    for bi in range(Bb):
        o_ref[bi, 0:Ch, :] = y1[bi * Ch:(bi + 1) * Ch, :]

    # -------- branch 2: 1x1 conv (all Bb images in one matmul) + GELU + pooled attention ----
    if Bb == 1:
        x2cat = x2_ref[0]                             # (Ch, HW)
    else:
        x2cat = jnp.concatenate([x2_ref[bi] for bi in range(Bb)], axis=-1)   # (Ch, Bb*HW)
    y = jnp.dot(wq_ref[...], x2cat, preferred_element_type=jnp.float32)
    y = _gelu(y + bq_ref[...])                        # (heads*Cq, Bb*HW)

    pavg = pavg_ref[...]                              # (HW, HoWo)   AvgPool(3,2,1) 1/9 taps
    pmax = pmax_ref[...]                              # (HW, 4*HoWo) MaxPool(2,2) candidate gather

    for bi in range(Bb):
        s0 = bi * HW
        # head split: heads [0 .. heads-4] summed -> q ; then k, v, lfeat
        q = y[0:Cq, s0:s0 + HW]
        for h in range(1, heads - 3):
            q = q + y[h * Cq:(h + 1) * Cq, s0:s0 + HW]
        k = y[(heads - 3) * Cq:(heads - 2) * Cq, s0:s0 + HW]
        v = y[(heads - 2) * Cq:(heads - 1) * Cq, s0:s0 + HW]
        o_ref[bi, Ch:Ch + Cq, :] = y[(heads - 1) * Cq:heads * Cq, s0:s0 + HW]   # lfeat

        # whole-map pooling via matmuls (K = HW)
        q_pool = jnp.dot(q, pavg, preferred_element_type=jnp.float32)          # (Cq, HoWo)
        km = jnp.dot(k, pmax, preferred_element_type=jnp.float32)              # (Cq, 4*HoWo)
        k_pool = jnp.maximum(
            jnp.maximum(km[:, 0:HoWo], km[:, HoWo:2 * HoWo]),
            jnp.maximum(km[:, 2 * HoWo:3 * HoWo], km[:, 3 * HoWo:4 * HoWo]))   # (Cq, HoWo)

        # At[j, i] = <q_i, k_j> over the pooled grid
        At = lax.dot_general(k_pool, q_pool, (((1,), (1,)), ((), ())),
                             preferred_element_type=jnp.float32)               # (Cq, Cq)

        # torch: softmax over the q-channel index (dim=1) -> lane-axis softmax of At
        At = At - jnp.max(At, axis=-1, keepdims=True)
        E = jnp.exp(At)
        St = E * _recip(jnp.sum(E, axis=-1, keepdims=True))
        o_ref[bi, Ch + Cq:C, :] = jnp.dot(St, v, preferred_element_type=jnp.float32)


# ------------------------------- wrapper (glue) ------------------------------------

def _pool_constants(H, W):
    """Whole-map pooling constants (exact): P_avg (HW, HoWo), P_max (HW, 4*HoWo)."""
    Ho, Wo = H // 2, W // 2
    HW, HoWo = H * W, Ho * Wo
    p_avg = np.zeros((HW, HoWo), np.float32)
    p_max = np.zeros((HW, 4 * HoWo), np.float32)
    for i in range(Ho):
        for j in range(Wo):
            m = i * Wo + j
            for dr in range(3):                      # AvgPool2d(3, 2, 1, count_include_pad)
                for dc in range(3):
                    r, c = 2 * i + dr - 1, 2 * j + dc - 1
                    if 0 <= r < H and 0 <= c < W:
                        p_avg[r * W + c, m] = 1.0 / 9.0
            for t in range(4):                       # MaxPool2d(2, 2): 4 one-hot candidates
                r, c = 2 * i + t // 2, 2 * j + t % 2
                p_max[r * W + c, t * HoWo + m] = 1.0
    return jnp.asarray(p_avg), jnp.asarray(p_max)


def elgca_forward(x, params, heads=4, batch_block=None):
    B, C, H, W = x.shape
    assert C % 4 == 0 and H % 2 == 0 and W % 2 == 0 and heads >= 4
    Ch, Cq = C // 2, C // 4
    HW = H * W
    HoWo = (H // 2) * (W // 2)

    if batch_block is not None:
        Bb = int(batch_block)
    else:
        # amortize the ~0.35us per-grid-step overhead, but keep G = B // Bb >= 2 whenever
        # possible so the grid can shard across both v7x TensorCores.
        Bb = 1
        for cand in range(min(8, max(B // 2, 1)), 0, -1):
            if B % cand == 0:
                Bb = cand
                break
    assert B % Bb == 0
    G = B // Bb

    # parameter reshapes (torch conv layouts -> kernel layouts); dw weights tiled over Bb
    wdw_t = jnp.tile(params["wdw"].reshape(Ch, 9), (Bb, 1))        # (Bb*Ch, 9)
    bdw_t = jnp.tile(params["bdw"].reshape(Ch, 1), (Bb, 1))        # (Bb*Ch, 1)
    wq_k = params["wq"].reshape(heads * Cq, Ch)                    # (heads*Cq, Ch)
    bq_k = params["bq"].reshape(heads * Cq, 1)                     # (heads*Cq, 1)

    # input split + NCHW-flat layout (metadata-only reshapes; no padding copies in HBM)
    x1f = x[:, :Ch].reshape(G, Bb * Ch, HW)
    x2f = x[:, Ch:].reshape(G, Bb, Ch, HW)

    p_avg, p_max = _pool_constants(H, W)

    # explicit VMEM budget (double-buffered blocks + resident constants + pad scratch),
    # clamped so the same config also fits v7x's 64 MiB VMEM.
    elt = 4
    step_elems = Bb * Ch * HW * 2 + Bb * C * HW
    const_elems = (Bb * Ch * 10 + heads * Cq * (Ch + 1) + HW * HoWo + HW * 4 * HoWo
                   + Bb * Ch * (HW + 2 * W + 2))
    vmem_limit = int(min(64 * 2 ** 20, max(32 * 2 ** 20, 6 * (step_elems + const_elems) * elt)))

    kernel = functools.partial(elgca_kernel, heads=heads, H=H, W=W)

    out = pl.pallas_call(
        kernel,
        grid=(G,),
        in_specs=[
            pl.BlockSpec((None, Bb * Ch, HW), lambda g: (g, 0, 0)),        # x1, NCHW-flat
            pl.BlockSpec((None, Bb, Ch, HW), lambda g: (g, 0, 0, 0)),      # x2, NCHW-flat
            pl.BlockSpec((Bb * Ch, 9), lambda g: (0, 0)),                  # dw weights (tiled)
            pl.BlockSpec((Bb * Ch, 1), lambda g: (0, 0)),                  # dw bias (tiled)
            pl.BlockSpec((heads * Cq, Ch), lambda g: (0, 0)),              # 1x1 conv weights
            pl.BlockSpec((heads * Cq, 1), lambda g: (0, 0)),               # 1x1 conv bias
            pl.BlockSpec((HW, HoWo), lambda g: (0, 0)),                    # avg-pool matrix
            pl.BlockSpec((HW, 4 * HoWo), lambda g: (0, 0)),                # max-pool gathers
        ],
        out_specs=pl.BlockSpec((None, Bb, C, HW), lambda g: (g, 0, 0, 0)),  # fused NCHW-flat out
        out_shape=jax.ShapeDtypeStruct((G, Bb, C, HW), jnp.float32),
        scratch_shapes=[pltpu.VMEM((Bb * Ch, HW + 2 * W + 2), jnp.float32)],  # in-kernel pad
        compiler_params=pltpu.CompilerParams(
            dimension_semantics=("parallel",),
            vmem_limit_bytes=vmem_limit),
    )(x1f, x2f, wdw_t, bdw_t, wq_k, bq_k, p_avg, p_max)

    # free metadata-only reshape: (G, Bb, C, HW) -> (B, C, H, W)
    return out.reshape(B, C, H, W)


# ------------------------------ pure-JAX reference ---------------------------------

def elgca_reference(x, params, heads=4):
    B, C, H, W = x.shape
    Ch, Cq = C // 2, C // 4
    hi = lax.Precision.HIGHEST
    x1, x2 = x[:, :Ch], x[:, Ch:]
    x1c = lax.conv_general_dilated(x1, params["wdw"], (1, 1), ((1, 1), (1, 1)),
                                   dimension_numbers=("NCHW", "OIHW", "NCHW"),
                                   feature_group_count=Ch, precision=hi)
    x1c = jax.nn.gelu(x1c + params["bdw"][None, :, None, None], approximate=False)
    x2c = lax.conv_general_dilated(x2, params["wq"], (1, 1), "VALID",
                                   dimension_numbers=("NCHW", "OIHW", "NCHW"), precision=hi)
    x2c = jax.nn.gelu(x2c + params["bq"][None, :, None, None], approximate=False)
    x2r = x2c.reshape(B, heads, Cq, H, W)
    q = jnp.sum(x2r[:, :heads - 3], axis=1)
    k = x2r[:, heads - 3]
    v = x2r[:, heads - 2].reshape(B, Cq, H * W)
    lfeat = x2r[:, heads - 1]
    q = lax.reduce_window(q, 0.0, lax.add, (1, 1, 3, 3), (1, 1, 2, 2),
                          ((0, 0), (0, 0), (1, 1), (1, 1))) / 9.0
    k = lax.reduce_window(k, -jnp.inf, lax.max, (1, 1, 2, 2), (1, 1, 2, 2), "VALID")
    qf, kf = q.reshape(B, Cq, -1), k.reshape(B, Cq, -1)
    qk = jnp.einsum("bin,bjn->bij", qf, kf, precision=hi)
    qk = jnp.swapaxes(jax.nn.softmax(qk, axis=1), 1, 2)
    x2o = jnp.einsum("bij,bjm->bim", qk, v, precision=hi).reshape(B, Cq, H, W)
    return jnp.concatenate([x1c, lfeat, x2o], axis=1)


# --------------------------------------- main --------------------------------------

if __name__ == "__main__":
    B, C, H, W, heads = 2, 32, 16, 16, 4
    Ch, Cq = C // 2, C // 4

    key = jax.random.PRNGKey(0)
    kx, k1, k2, k3, k4 = jax.random.split(key, 5)
    x = jax.random.normal(kx, (B, C, H, W), dtype=jnp.float32)
    params = {
        "wdw": 0.3 * jax.random.normal(k1, (Ch, 1, 3, 3), dtype=jnp.float32),
        "bdw": 0.1 * jax.random.normal(k2, (Ch,), dtype=jnp.float32),
        "wq": 0.2 * jax.random.normal(k3, (heads * Cq, Ch, 1, 1), dtype=jnp.float32),
        "bq": 0.1 * jax.random.normal(k4, (heads * Cq,), dtype=jnp.float32),
    }

    out = jax.block_until_ready(elgca_forward(x, params, heads=heads))
    ref = jax.block_until_ready(elgca_reference(x, params, heads=heads))

    assert out.shape == (B, C, H, W), out.shape
    np.testing.assert_allclose(np.asarray(out), np.asarray(ref), rtol=2e-3, atol=2e-3)
    print("KERNEL_OK")
</pallas_src>

<mosaic_0001>
module attributes {stable_mosaic.version = 11 : i64} {
  func.func @elgca_kernel(%arg0: i32, %arg1: memref<1x16x256xf32, #tpu.memory_space<vmem>>, %arg2: memref<1x1x16x256xf32, #tpu.memory_space<vmem>>, %arg3: memref<16x9xf32, #tpu.memory_space<vmem>>, %arg4: memref<16x1xf32, #tpu.memory_space<vmem>>, %arg5: memref<32x16xf32, #tpu.memory_space<vmem>>, %arg6: memref<32x1xf32, #tpu.memory_space<vmem>>, %arg7: memref<256x64xf32, #tpu.memory_space<vmem>>, %arg8: memref<256x256xf32, #tpu.memory_space<vmem>>, %arg9: memref<1x1x32x256xf32, #tpu.memory_space<vmem>>, %arg10: memref<16x290xf32, #tpu.memory_space<vmem>>) attributes {dimension_semantics = [#tpu.dimension_semantics<parallel>], iteration_bounds = array<i64: 2>, scalar_prefetch = 0 : i64, scratch_operands = 1 : i64, tpu.core_type = #tpu.core_type<tc>, window_params = [{transform_indices = @transform_0, window_bounds = array<i64: 1, 16, 256>}, {transform_indices = @transform_1, window_bounds = array<i64: 1, 1, 16, 256>}, {pipeline_mode = #tpu.pipeline_mode<synchronous>, transform_indices = @transform_2, window_bounds = array<i64: 16, 9>}, {pipeline_mode = #tpu.pipeline_mode<synchronous>, transform_indices = @transform_3, window_bounds = array<i64: 16, 1>}, {pipeline_mode = #tpu.pipeline_mode<synchronous>, transform_indices = @transform_4, window_bounds = array<i64: 32, 16>}, {pipeline_mode = #tpu.pipeline_mode<synchronous>, transform_indices = @transform_5, window_bounds = array<i64: 32, 1>}, {pipeline_mode = #tpu.pipeline_mode<synchronous>, transform_indices = @transform_6, window_bounds = array<i64: 256, 64>}, {pipeline_mode = #tpu.pipeline_mode<synchronous>, transform_indices = @transform_7, window_bounds = array<i64: 256, 256>}, {transform_indices = @transform_8, window_bounds = array<i64: 1, 1, 32, 256>}]} {
    %cst = arith.constant 0.000000e+00 : f32
    %0 = vector.broadcast %cst : f32 to vector<16x17xf32>
    %c0 = arith.constant 0 : index
    %c0_0 = arith.constant 0 : index
    %1 = vector.load %arg10[%c0, %c0_0] : memref<16x290xf32, #tpu.memory_space<vmem>>, vector<16x17xf32>
    tpu.vector_store %arg10[%c0, %c0_0], %0 {strides = array<i32>} : memref<16x290xf32, #tpu.memory_space<vmem>>, vector<16x17xf32>,
    %c0_1 = arith.constant 0 : index
    %c273 = arith.constant 273 : index
    %2 = vector.load %arg10[%c0_1, %c273] : memref<16x290xf32, #tpu.memory_space<vmem>>, vector<16x17xf32>
    tpu.vector_store %arg10[%c0_1, %c273], %0 {strides = array<i32>} : memref<16x290xf32, #tpu.memory_space<vmem>>, vector<16x17xf32>,
    %c0_2 = arith.constant 0 : index
    %c0_3 = arith.constant 0 : index
    %c0_4 = arith.constant 0 : index
    %3 = vector.load %arg1[%c0_2, %c0_3, %c0_4] : memref<1x16x256xf32, #tpu.memory_space<vmem>>, vector<1x16x256xf32>
    %4 = vector.shape_cast %3 : vector<1x16x256xf32> to vector<16x256xf32>
    %c0_5 = arith.constant 0 : index
    %c17 = arith.constant 17 : index
    %5 = vector.load %arg10[%c0_5, %c17] : memref<16x290xf32, #tpu.memory_space<vmem>>, vector<16x256xf32>
    tpu.vector_store %arg10[%c0_5, %c17], %4 {strides = array<i32>} : memref<16x290xf32, #tpu.memory_space<vmem>>, vector<16x256xf32>,
    %c0_6 = arith.constant 0 : index
    %c0_7 = arith.constant 0 : index
    %6 = vector.load %arg10[%c0_6, %c0_7] : memref<16x290xf32, #tpu.memory_space<vmem>>, vector<16x290xf32>
    %7 = tpu.iota {dimensions = array<i32: 1>} : vector<1x256xi32>
    %c16_i32 = arith.constant 16 : i32
    %c0_i32 = arith.constant 0 : i32
    %8 = arith.cmpi eq, %c16_i32, %c0_i32 : i32
    %c1_i32 = arith.constant 1 : i32
    %9 = arith.select %8, %c1_i32, %c16_i32 : i32
    %10 = vector.broadcast %9 : i32 to vector<1x256xi32>
    %11 = arith.remsi %7, %10 : vector<1x256xi32>
    %c0_i32_8 = arith.constant 0 : i32
    %12 = vector.broadcast %c0_i32_8 : i32 to vector<1x256xi32>
    %13 = arith.cmpi ne, %11, %12 : vector<1x256xi32>
    %c0_i32_9 = arith.constant 0 : i32
    %14 = vector.broadcast %c0_i32_9 : i32 to vector<1x256xi32>
    %15 = arith.cmpi slt, %11, %14 : vector<1x256xi32>
    %c0_i32_10 = arith.constant 0 : i32
    %16 = arith.cmpi slt, %9, %c0_i32_10 : i32
    %17 = vector.broadcast %16 : i1 to vector<1x256xi1>
    %18 = vector.broadcast %17 : vector<1x256xi1> to vector<1x256xi1>
    %19 = arith.xori %15, %18 : vector<1x256xi1>
    %20 = arith.andi %19, %13 : vector<1x256xi1>
    %21 = vector.broadcast %9 : i32 to vector<1x256xi32>
    %22 = arith.addi %11, %21 : vector<1x256xi32>
    %23 = arith.select %20, %22, %11 : vector<1x256xi1>, vector<1x256xi32>
    %c0_i32_11 = arith.constant 0 : i32
    %24 = vector.broadcast %c0_i32_11 : i32 to vector<1x256xi32>
    %25 = arith.cmpi sgt, %23, %24 : vector<1x256xi32>
    %cst_12 = arith.constant 1.000000e+00 : f32
    %cst_13 = arith.constant 0.000000e+00 : f32
    %26 = vector.broadcast %cst_12 : f32 to vector<1x256xf32>
    %27 = vector.broadcast %cst_13 : f32 to vector<1x256xf32>
    %28 = arith.select %25, %26, %27 : vector<1x256xi1>, vector<1x256xf32>
    %c15_i32 = arith.constant 15 : i32
    %29 = vector.broadcast %c15_i32 : i32 to vector<1x256xi32>
    %30 = arith.cmpi slt, %23, %29 : vector<1x256xi32>
    %cst_14 = arith.constant 1.000000e+00 : f32
    %cst_15 = arith.constant 0.000000e+00 : f32
    %31 = vector.broadcast %cst_14 : f32 to vector<1x256xf32>
    %32 = vector.broadcast %cst_15 : f32 to vector<1x256xf32>
    %33 = arith.select %30, %31, %32 : vector<1x256xi1>, vector<1x256xf32>
    %c0_16 = arith.constant 0 : index
    %c0_17 = arith.constant 0 : index
    %34 = vector.load %arg3[%c0_16, %c0_17] : memref<16x9xf32, #tpu.memory_space<vmem>>, vector<16x9xf32>
    %cst_18 = arith.constant 0.000000e+00 : f32
    %35 = vector.broadcast %cst_18 : f32 to vector<16x256xf32>
    %36 = vector.extract_strided_slice %6 {offsets = [0, 0], sizes = [16, 256], strides = [1, 1]} : vector<16x290xf32> to vector<16x256xf32>
    %37 = vector.extract_strided_slice %34 {offsets = [0, 0], sizes = [16, 1], strides = [1, 1]} : vector<16x9xf32> to vector<16x1xf32>
    %38 = vector.broadcast %37 : vector<16x1xf32> to vector<16x256xf32>
    %39 = arith.mulf %36, %38 : vector<16x256xf32>
    %40 = vector.extract_strided_slice %6 {offsets = [0, 16], sizes = [16, 256], strides = [1, 1]} : vector<16x290xf32> to vector<16x256xf32>
    %41 = vector.extract_strided_slice %34 {offsets = [0, 3], sizes = [16, 1], strides = [1, 1]} : vector<16x9xf32> to vector<16x1xf32>
    %42 = vector.broadcast %41 : vector<16x1xf32> to vector<16x256xf32>
    %43 = arith.mulf %40, %42 : vector<16x256xf32>
    %44 = arith.addf %39, %43 : vector<16x256xf32>
    %45 = vector.extract_strided_slice %6 {offsets = [0, 32], sizes = [16, 256], strides = [1, 1]} : vector<16x290xf32> to vector<16x256xf32>
    %46 = vector.extract_strided_slice %34 {offsets = [0, 6], sizes = [16, 1], strides = [1, 1]} : vector<16x9xf32> to vector<16x1xf32>
    %47 = vector.broadcast %46 : vector<16x1xf32> to vector<16x256xf32>
    %48 = arith.mulf %45, %47 : vector<16x256xf32>
    %49 = arith.addf %44, %48 : vector<16x256xf32>
    %50 = vector.broadcast %28 : vector<1x256xf32> to vector<16x256xf32>
    %51 = arith.mulf %49, %50 : vector<16x256xf32>
    %52 = arith.addf %35, %51 : vector<16x256xf32>
    %53 = vector.extract_strided_slice %6 {offsets = [0, 1], sizes = [16, 256], strides = [1, 1]} : vector<16x290xf32> to vector<16x256xf32>
    %54 = vector.extract_strided_slice %34 {offsets = [0, 1], sizes = [16, 1], strides = [1, 1]} : vector<16x9xf32> to vector<16x1xf32>
    %55 = vector.broadcast %54 : vector<16x1xf32> to vector<16x256xf32>
    %56 = arith.mulf %53, %55 : vector<16x256xf32>
    %57 = vector.extract_strided_slice %6 {offsets = [0, 17], sizes = [16, 256], strides = [1, 1]} : vector<16x290xf32> to vector<16x256xf32>
    %58 = vector.extract_strided_slice %34 {offsets = [0, 4], sizes = [16, 1], strides = [1, 1]} : vector<16x9xf32> to vector<16x1xf32>
    %59 = vector.broadcast %58 : vector<16x1xf32> to vector<16x256xf32>
    %60 = arith.mulf %57, %59 : vector<16x256xf32>
    %61 = arith.addf %56, %60 : vector<16x256xf32>
    %62 = vector.extract_strided_slice %6 {offsets = [0, 33], sizes = [16, 256], strides = [1, 1]} : vector<16x290xf32> to vector<16x256xf32>
    %63 = vector.extract_strided_slice %34 {offsets = [0, 7], sizes = [16, 1], strides = [1, 1]} : vector<16x9xf32> to vector<16x1xf32>
    %64 = vector.broadcast %63 : vector<16x1xf32> to vector<16x256xf32>
    %65 = arith.mulf %62, %64 : vector<16x256xf32>
    %66 = arith.addf %61, %65 : vector<16x256xf32>
    %67 = arith.addf %52, %66 : vector<16x256xf32>
    %68 = vector.extract_strided_slice %6 {offsets = [0, 2], sizes = [16, 256], strides = [1, 1]} : vector<16x290xf32> to vector<16x256xf32>
    %69 = vector.extract_strided_slice %34 {offsets = [0, 2], sizes = [16, 1], strides = [1, 1]} : vector<16x9xf32> to vector<16x1xf32>
    %70 = vector.broadcast %69 : vector<16x1xf32> to vector<16x256xf32>
    %71 = arith.mulf %68, %70 : vector<16x256xf32>
    %72 = vector.extract_strided_slice %6 {offsets = [0, 18], sizes = [16, 256], strides = [1, 1]} : vector<16x290xf32> to vector<16x256xf32>
    %73 = vector.extract_strided_slice %34 {offsets = [0, 5], sizes = [16, 1], strides = [1, 1]} : vector<16x9xf32> to vector<16x1xf32>
    %74 = vector.broadcast %73 : vector<16x1xf32> to vector<16x256xf32>
    %75 = arith.mulf %72, %74 : vector<16x256xf32>
    %76 = arith.addf %71, %75 : vector<16x256xf32>
    %77 = vector.extract_strided_slice %6 {offsets = [0, 34], sizes = [16, 256], strides = [1, 1]} : vector<16x290xf32> to vector<16x256xf32>
    %78 = vector.extract_strided_slice %34 {offsets = [0, 8], sizes = [16, 1], strides = [1, 1]} : vector<16x9xf32> to vector<16x1xf32>
    %79 = vector.broadcast %78 : vector<16x1xf32> to vector<16x256xf32>
    %80 = arith.mulf %77, %79 : vector<16x256xf32>
    %81 = arith.addf %76, %80 : vector<16x256xf32>
    %82 = vector.broadcast %33 : vector<1x256xf32> to vector<16x256xf32>
    %83 = arith.mulf %81, %82 : vector<16x256xf32>
    %84 = arith.addf %67, %83 : vector<16x256xf32>
    %c0_19 = arith.constant 0 : index
    %c0_20 = arith.constant 0 : index
    %85 = vector.load %arg4[%c0_19, %c0_20] : memref<16x1xf32, #tpu.memory_space<vmem>>, vector<16x1xf32>
    %86 = vector.broadcast %85 : vector<16x1xf32> to vector<16x256xf32>
    %87 = arith.addf %84, %86 : vector<16x256xf32>
    %cst_21 = arith.constant 5.000000e-01 : f32
    %88 = vector.broadcast %cst_21 : f32 to vector<16x256xf32>
    %89 = arith.mulf %88, %87 : vector<16x256xf32>
    %cst_22 = arith.constant 0.707106769 : f32
    %90 = vector.broadcast %cst_22 : f32 to vector<16x256xf32>
    %91 = arith.mulf %87, %90 : vector<16x256xf32>
    %92 = math.absf %91 : vector<16x256xf32>
    %cst_23 = arith.constant 0.327591091 : f32
    %93 = vector.broadcast %cst_23 : f32 to vector<16x256xf32>
    %94 = arith.mulf %93, %92 : vector<16x256xf32>
    %cst_24 = arith.constant 1.000000e+00 : f32
    %95 = vector.broadcast %cst_24 : f32 to vector<16x256xf32>
    %96 = arith.addf %95, %94 : vector<16x256xf32>
    %97 = tpu.reciprocal %96 {approx = true} : vector<16x256xf32> -> vector<16x256xf32>
    %98 = arith.mulf %96, %97 : vector<16x256xf32>
    %cst_25 = arith.constant 2.000000e+00 : f32
    %99 = vector.broadcast %cst_25 : f32 to vector<16x256xf32>
    %100 = arith.subf %99, %98 : vector<16x256xf32>
    %101 = arith.mulf %97, %100 : vector<16x256xf32>
    %cst_26 = arith.constant 1.06140542 : f32
    %102 = vector.broadcast %cst_26 : f32 to vector<16x256xf32>
    %103 = arith.mulf %102, %101 : vector<16x256xf32>
    %cst_27 = arith.constant -1.45315206 : f32
    %104 = vector.broadcast %cst_27 : f32 to vector<16x256xf32>
    %105 = arith.addf %103, %104 : vector<16x256xf32>
    %106 = arith.mulf %105, %101 : vector<16x256xf32>
    %cst_28 = arith.constant 1.42141378 : f32
    %107 = vector.broadcast %cst_28 : f32 to vector<16x256xf32>
    %108 = arith.addf %106, %107 : vector<16x256xf32>
    %109 = arith.mulf %108, %101 : vector<16x256xf32>
    %cst_29 = arith.constant -0.284496725 : f32
    %110 = vector.broadcast %cst_29 : f32 to vector<16x256xf32>
    %111 = arith.addf %109, %110 : vector<16x256xf32>
    %112 = arith.mulf %111, %101 : vector<16x256xf32>
    %cst_30 = arith.constant 0.254829586 : f32
    %113 = vector.broadcast %cst_30 : f32 to vector<16x256xf32>
    %114 = arith.addf %112, %113 : vector<16x256xf32>
    %115 = arith.mulf %114, %101 : vector<16x256xf32>
    %cst_31 = arith.constant 0.000000e+00 : f32
    %116 = vector.broadcast %cst_31 : f32 to vector<16x256xf32>
    %117 = arith.subf %116, %92 : vector<16x256xf32>
    %118 = arith.mulf %117, %92 : vector<16x256xf32>
    %119 = math.exp %118 : vector<16x256xf32>
    %120 = arith.mulf %115, %119 : vector<16x256xf32>
    %cst_32 = arith.constant 1.000000e+00 : f32
    %121 = vector.broadcast %cst_32 : f32 to vector<16x256xf32>
    %122 = arith.subf %121, %120 : vector<16x256xf32>
    %cst_33 = arith.constant 0.000000e+00 : f32
    %123 = vector.broadcast %cst_33 : f32 to vector<16x256xf32>
    %124 = arith.cmpf oge, %91, %123 : vector<16x256xf32>
    %cst_34 = arith.constant 0.000000e+00 : f32
    %125 = vector.broadcast %cst_34 : f32 to vector<16x256xf32>
    %126 = arith.subf %125, %122 : vector<16x256xf32>
    %127 = arith.select %124, %122, %126 : vector<16x256xi1>, vector<16x256xf32>
    %cst_35 = arith.constant 1.000000e+00 : f32
    %128 = vector.broadcast %cst_35 : f32 to vector<16x256xf32>
    %129 = arith.addf %128, %127 : vector<16x256xf32>
    %130 = arith.mulf %89, %129 : vector<16x256xf32>
    %c0_36 = arith.constant 0 : index
    %c0_37 = arith.constant 0 : index
    %c0_38 = arith.constant 0 : index
    %c0_39 = arith.constant 0 : index
    %131 = vector.load %arg9[%c0_36, %c0_37, %c0_38, %c0_39] : memref<1x1x32x256xf32, #tpu.memory_space<vmem>>, vector<1x1x16x256xf32>
    %132 = vector.shape_cast %131 : vector<1x1x16x256xf32> to vector<16x256xf32>
    %133 = vector.shape_cast %130 : vector<16x256xf32> to vector<1x1x16x256xf32>
    tpu.vector_store %arg9[%c0_36, %c0_37, %c0_38, %c0_39], %133 {strides = array<i32>} : memref<1x1x32x256xf32, #tpu.memory_space<vmem>>, vector<1x1x16x256xf32>,
    %c0_40 = arith.constant 0 : index
    %c0_41 = arith.constant 0 : index
    %c0_42 = arith.constant 0 : index
    %c0_43 = arith.constant 0 : index
    %134 = vector.load %arg2[%c0_40, %c0_41, %c0_42, %c0_43] : memref<1x1x16x256xf32, #tpu.memory_space<vmem>>, vector<1x1x16x256xf32>
    %135 = vector.shape_cast %134 : vector<1x1x16x256xf32> to vector<16x256xf32>
    %c0_44 = arith.constant 0 : index
    %c0_45 = arith.constant 0 : index
    %136 = vector.load %arg5[%c0_44, %c0_45] : memref<32x16xf32, #tpu.memory_space<vmem>>, vector<32x16xf32>
    %cst_46 = arith.constant dense<0.000000e+00> : vector<32x256xf32>
    %137 = tpu.matmul %136, %135, %cst_46 {dimension_numbers = #tpu.dot_dimension_numbers<[1], [0], [0], [1], [0, 0, 1, 1], [], []>} : vector<32x16xf32>, vector<16x256xf32>, vector<32x256xf32> -> vector<32x256xf32>
    %c0_47 = arith.constant 0 : index
    %c0_48 = arith.constant 0 : index
    %138 = vector.load %arg6[%c0_47, %c0_48] : memref<32x1xf32, #tpu.memory_space<vmem>>, vector<32x1xf32>
    %139 = vector.broadcast %138 : vector<32x1xf32> to vector<32x256xf32>
    %140 = arith.addf %137, %139 : vector<32x256xf32>
    %cst_49 = arith.constant 5.000000e-01 : f32
    %141 = vector.broadcast %cst_49 : f32 to vector<32x256xf32>
    %142 = arith.mulf %141, %140 : vector<32x256xf32>
    %cst_50 = arith.constant 0.707106769 : f32
    %143 = vector.broadcast %cst_50 : f32 to vector<32x256xf32>
    %144 = arith.mulf %140, %143 : vector<32x256xf32>
    %145 = math.absf %144 : vector<32x256xf32>
    %cst_51 = arith.constant 0.327591091 : f32
    %146 = vector.broadcast %cst_51 : f32 to vector<32x256xf32>
    %147 = arith.mulf %146, %145 : vector<32x256xf32>
    %cst_52 = arith.constant 1.000000e+00 : f32
    %148 = vector.broadcast %cst_52 : f32 to vector<32x256xf32>
    %149 = arith.addf %148, %147 : vector<32x256xf32>
    %150 = tpu.reciprocal %149 {approx = true} : vector<32x256xf32> -> vector<32x256xf32>
    %151 = arith.mulf %149, %150 : vector<32x256xf32>
    %cst_53 = arith.constant 2.000000e+00 : f32
    %152 = vector.broadcast %cst_53 : f32 to vector<32x256xf32>
    %153 = arith.subf %152, %151 : vector<32x256xf32>
    %154 = arith.mulf %150, %153 : vector<32x256xf32>
    %cst_54 = arith.constant 1.06140542 : f32
    %155 = vector.broadcast %cst_54 : f32 to vector<32x256xf32>
    %156 = arith.mulf %155, %154 : vector<32x256xf32>
    %cst_55 = arith.constant -1.45315206 : f32
    %157 = vector.broadcast %cst_55 : f32 to vector<32x256xf32>
    %158 = arith.addf %156, %157 : vector<32x256xf32>
    %159 = arith.mulf %158, %154 : vector<32x256xf32>
    %cst_56 = arith.constant 1.42141378 : f32
    %160 = vector.broadcast %cst_56 : f32 to vector<32x256xf32>
    %161 = arith.addf %159, %160 : vector<32x256xf32>
    %162 = arith.mulf %161, %154 : vector<32x256xf32>
    %cst_57 = arith.constant -0.284496725 : f32
    %163 = vector.broadcast %cst_57 : f32 to vector<32x256xf32>
    %164 = arith.addf %162, %163 : vector<32x256xf32>
    %165 = arith.mulf %164, %154 : vector<32x256xf32>
    %cst_58 = arith.constant 0.254829586 : f32
    %166 = vector.broadcast %cst_58 : f32 to vector<32x256xf32>
    %167 = arith.addf %165, %166 : vector<32x256xf32>
    %168 = arith.mulf %167, %154 : vector<32x256xf32>
    %cst_59 = arith.constant 0.000000e+00 : f32
    %169 = vector.broadcast %cst_59 : f32 to vector<32x256xf32>
    %170 = arith.subf %169, %145 : vector<32x256xf32>
    %171 = arith.mulf %170, %145 : vector<32x256xf32>
    %172 = math.exp %171 : vector<32x256xf32>
    %173 = arith.mulf %168, %172 : vector<32x256xf32>
    %cst_60 = arith.constant 1.000000e+00 : f32
    %174 = vector.broadcast %cst_60 : f32 to vector<32x256xf32>
    %175 = arith.subf %174, %173 : vector<32x256xf32>
    %cst_61 = arith.constant 0.000000e+00 : f32
    %176 = vector.broadcast %cst_61 : f32 to vector<32x256xf32>
    %177 = arith.cmpf oge, %144, %176 : vector<32x256xf32>
    %cst_62 = arith.constant 0.000000e+00 : f32
    %178 = vector.broadcast %cst_62 : f32 to vector<32x256xf32>
    %179 = arith.subf %178, %175 : vector<32x256xf32>
    %180 = arith.select %177, %175, %179 : vector<32x256xi1>, vector<32x256xf32>
    %cst_63 = arith.constant 1.000000e+00 : f32
    %181 = vector.broadcast %cst_63 : f32 to vector<32x256xf32>
    %182 = arith.addf %181, %180 : vector<32x256xf32>
    %183 = arith.mulf %142, %182 : vector<32x256xf32>
    %c0_64 = arith.constant 0 : index
    %c0_65 = arith.constant 0 : index
    %184 = vector.load %arg7[%c0_64, %c0_65] : memref<256x64xf32, #tpu.memory_space<vmem>>, vector<256x64xf32>
    %c0_66 = arith.constant 0 : index
    %c0_67 = arith.constant 0 : index
    %185 = vector.load %arg8[%c0_66, %c0_67] : memref<256x256xf32, #tpu.memory_space<vmem>>, vector<256x256xf32>
    %186 = vector.extract_strided_slice %183 {offsets = [0, 0], sizes = [8, 256], strides = [1, 1]} : vector<32x256xf32> to vector<8x256xf32>
    %187 = vector.extract_strided_slice %183 {offsets = [8, 0], sizes = [8, 256], strides = [1, 1]} : vector<32x256xf32> to vector<8x256xf32>
    %188 = vector.extract_strided_slice %183 {offsets = [16, 0], sizes = [8, 256], strides = [1, 1]} : vector<32x256xf32> to vector<8x256xf32>
    %189 = vector.extract_strided_slice %183 {offsets = [24, 0], sizes = [8, 256], strides = [1, 1]} : vector<32x256xf32> to vector<8x256xf32>
    %c0_68 = arith.constant 0 : index
    %c0_69 = arith.constant 0 : index
    %c16 = arith.constant 16 : index
    %c0_70 = arith.constant 0 : index
    %190 = vector.load %arg9[%c0_68, %c0_69, %c16, %c0_70] : memref<1x1x32x256xf32, #tpu.memory_space<vmem>>, vector<1x1x8x256xf32>
    %191 = vector.shape_cast %190 : vector<1x1x8x256xf32> to vector<8x256xf32>
    %192 = vector.shape_cast %189 : vector<8x256xf32> to vector<1x1x8x256xf32>
    tpu.vector_store %arg9[%c0_68, %c0_69, %c16, %c0_70], %192 {strides = array<i32>} : memref<1x1x32x256xf32, #tpu.memory_space<vmem>>, vector<1x1x8x256xf32>,
    %cst_71 = arith.constant dense<0.000000e+00> : vector<8x64xf32>
    %193 = tpu.matmul %186, %184, %cst_71 {dimension_numbers = #tpu.dot_dimension_numbers<[1], [0], [0], [1], [0, 0, 1, 1], [], []>} : vector<8x256xf32>, vector<256x64xf32>, vector<8x64xf32> -> vector<8x64xf32>
    %cst_72 = arith.constant dense<0.000000e+00> : vector<8x256xf32>
    %194 = tpu.matmul %187, %185, %cst_72 {dimension_numbers = #tpu.dot_dimension_numbers<[1], [0], [0], [1], [0, 0, 1, 1], [], []>} : vector<8x256xf32>, vector<256x256xf32>, vector<8x256xf32> -> vector<8x256xf32>
    %195 = vector.extract_strided_slice %194 {offsets = [0, 0], sizes = [8, 64], strides = [1, 1]} : vector<8x256xf32> to vector<8x64xf32>
    %196 = vector.extract_strided_slice %194 {offsets = [0, 64], sizes = [8, 64], strides = [1, 1]} : vector<8x256xf32> to vector<8x64xf32>
    %197 = arith.maximumf %195, %196 : vector<8x64xf32>
    %198 = vector.extract_strided_slice %194 {offsets = [0, 128], sizes = [8, 64], strides = [1, 1]} : vector<8x256xf32> to vector<8x64xf32>
    %199 = vector.extract_strided_slice %194 {offsets = [0, 192], sizes = [8, 64], strides = [1, 1]} : vector<8x256xf32> to vector<8x64xf32>
    %200 = arith.maximumf %198, %199 : vector<8x64xf32>
    %201 = arith.maximumf %197, %200 : vector<8x64xf32>
    %cst_73 = arith.constant dense<0.000000e+00> : vector<8x8xf32>
    %202 = tpu.matmul %201, %193, %cst_73 {dimension_numbers = #tpu.dot_dimension_numbers<[1], [1], [0], [0], [0, 0, 1, 0], [], []>} : vector<8x64xf32>, vector<8x64xf32>, vector<8x8xf32> -> vector<8x8xf32>
    %cst_74 = arith.constant dense<0xFF800000> : vector<8xf32>
    %203 = vector.multi_reduction <maximumf>, %202, %cst_74 [1] : vector<8x8xf32> to vector<8xf32>
    %204 = vector.shape_cast %203 : vector<8xf32> to vector<8x1xf32>
    %205 = vector.broadcast %204 : vector<8x1xf32> to vector<8x8xf32>
    %206 = arith.subf %202, %205 : vector<8x8xf32>
    %207 = math.exp %206 : vector<8x8xf32>
    %cst_75 = arith.constant dense<0.000000e+00> : vector<8xf32>
    %208 = vector.multi_reduction <add>, %207, %cst_75 [1] : vector<8x8xf32> to vector<8xf32>
    %209 = vector.shape_cast %208 : vector<8xf32> to vector<8x1xf32>
    %210 = tpu.reciprocal %209 {approx = true} : vector<8x1xf32> -> vector<8x1xf32>
    %211 = arith.mulf %209, %210 : vector<8x1xf32>
    %cst_76 = arith.constant 2.000000e+00 : f32
    %212 = vector.broadcast %cst_76 : f32 to vector<8x1xf32>
    %213 = arith.subf %212, %211 : vector<8x1xf32>
    %214 = arith.mulf %210, %213 : vector<8x1xf32>
    %215 = vector.broadcast %214 : vector<8x1xf32> to vector<8x8xf32>
    %216 = arith.mulf %207, %215 : vector<8x8xf32>
    %cst_77 = arith.constant dense<0.000000e+00> : vector<8x256xf32>
    %217 = tpu.matmul %216, %188, %cst_77 {dimension_numbers = #tpu.dot_dimension_numbers<[1], [0], [0], [1], [0, 0, 1, 1], [], []>} : vector<8x8xf32>, vector<8x256xf32>, vector<8x256xf32> -> vector<8x256xf32>
    %c0_78 = arith.constant 0 : index
    %c0_79 = arith.constant 0 : index
    %c24 = arith.constant 24 : index
    %c0_80 = arith.constant 0 : index
    %218 = vector.load %arg9[%c0_78, %c0_79, %c24, %c0_80] : memref<1x1x32x256xf32, #tpu.memory_space<vmem>>, vector<1x1x8x256xf32>
    %219 = vector.shape_cast %218 : vector<1x1x8x256xf32> to vector<8x256xf32>
    %220 = vector.shape_cast %217 : vector<8x256xf32> to vector<1x1x8x256xf32>
    tpu.vector_store %arg9[%c0_78, %c0_79, %c24, %c0_80], %220 {strides = array<i32>} : memref<1x1x32x256xf32, #tpu.memory_space<vmem>>, vector<1x1x8x256xf32>,
    return
  }
  func.func @transform_0(%arg0: i32) -> (i32, i32, i32) {
    %c0_i32 = arith.constant 0 : i32
    %c0_i32_0 = arith.constant 0 : i32
    %c0_i32_1 = arith.constant 0 : i32
    return %arg0, %c0_i32, %c0_i32_0 : i32, i32, i32
  }
  func.func @transform_1(%arg0: i32) -> (i32, i32, i32, i32) {
    %c0_i32 = arith.constant 0 : i32
    %c0_i32_0 = arith.constant 0 : i32
    %c0_i32_1 = arith.constant 0 : i32
    %c0_i32_2 = arith.constant 0 : i32
    return %arg0, %c0_i32, %c0_i32_0, %c0_i32_1 : i32, i32, i32, i32
  }
  func.func @transform_2(%arg0: i32) -> (i32, i32) {
    %c0_i32 = arith.constant 0 : i32
    %c0_i32_0 = arith.constant 0 : i32
    %c0_i32_1 = arith.constant 0 : i32
    return %c0_i32, %c0_i32_0 : i32, i32
  }
  func.func @transform_3(%arg0: i32) -> (i32, i32) {
    %c0_i32 = arith.constant 0 : i32
    %c0_i32_0 = arith.constant 0 : i32
    %c0_i32_1 = arith.constant 0 : i32
    return %c0_i32, %c0_i32_0 : i32, i32
  }
  func.func @transform_4(%arg0: i32) -> (i32, i32) {
    %c0_i32 = arith.constant 0 : i32
    %c0_i32_0 = arith.constant 0 : i32
    %c0_i32_1 = arith.constant 0 : i32
    return %c0_i32, %c0_i32_0 : i32, i32
  }
  func.func @transform_5(%arg0: i32) -> (i32, i32) {
    %c0_i32 = arith.constant 0 : i32
    %c0_i32_0 = arith.constant 0 : i32
    %c0_i32_1 = arith.constant 0 : i32
    return %c0_i32, %c0_i32_0 : i32, i32
  }
  func.func @transform_6(%arg0: i32) -> (i32, i32) {
    %c0_i32 = arith.constant 0 : i32
    %c0_i32_0 = arith.constant 0 : i32
    %c0_i32_1 = arith.constant 0 : i32
    return %c0_i32, %c0_i32_0 : i32, i32
  }
  func.func @transform_7(%arg0: i32) -> (i32, i32) {
    %c0_i32 = arith.constant 0 : i32
    %c0_i32_0 = arith.constant 0 : i32
    %c0_i32_1 = arith.constant 0 : i32
    return %c0_i32, %c0_i32_0 : i32, i32
  }
  func.func @transform_8(%arg0: i32) -> (i32, i32, i32, i32) {
    %c0_i32 = arith.constant 0 : i32
    %c0_i32_0 = arith.constant 0 : i32
    %c0_i32_1 = arith.constant 0 : i32
    %c0_i32_2 = arith.constant 0 : i32
    return %arg0, %c0_i32, %c0_i32_0, %c0_i32_1 : i32, i32, i32, i32
  }
}

</mosaic_0001>

<bundles_post_ra>
// kernel: tpu_custom_call.1
= control target key start
LH: loop header
LB: loop body
LE: loop exit
PB: predicated region body
PF: predicated region fallthrough
CT: control target
= control target key end

     0   :  { %13 = vsyncpa [#allocation4], 0  ;;  %s2964_s0 = inlined_call_operand.vmem [shape: f32[2,16,256], index: 0, kind: input, shape index: {}]   ;;  %s2965_s1 = inlined_call_operand.vmem [shape: f32[2,1,16,256], index: 1, kind: input, shape index: {}]   ;;  %s2966_s2 = inlined_call_operand.vmem [shape: f32[16,9], index: 2, kind: input, shape index: {}]   ;;  %s2967_s3 = inlined_call_operand.vmem [shape: f32[16,1], index: 3, kind: input, shape index: {}]   ;;  %s2968_s4 = inlined_call_operand.vmem [shape: f32[32,16], index: 4, kind: input, shape index: {}]   ;;  %s2969_s5 = inlined_call_operand.vmem [shape: f32[32,1], index: 5, kind: input, shape index: {}]   ;;  %s2970_s6 = inlined_call_operand.vmem [shape: f32[256,64], index: 6, kind: input, shape index: {}]   ;;  %s2971_s7 = inlined_call_operand.hbm [shape: f32[256,256], index: 7, kind: input, shape index: {}]   ;;  %s2972_s8 = inlined_call_operand.hbm [shape: f32[2,1,32,256], index: 8, kind: output, shape index: {}]  }
   0x1   :  { %14 = vsyncpa [#allocation5], 0 }
   0x2   :  { %16 = vsyncpa [#allocation5 + $0x1], 0  ;;  %s2329_s27 = smov 0   ;;  %s2331_s28 = smov 0  }
   0x3   :  { %s2333_s29 = smov 0   ;;  %s2335_s30 = smov 0  }
   0x4 LB: > { %s2350_s9 = sadd.s32 4294967295, %s2258_s30   ;;  %s1850_s10 = sadd.s32 4294967294, %s2258_s30   ;;  %s2258_s30 = sphi %s2335_s30, %s2988_s30   ;;  %s2254_s29 = sphi %s2333_s29, %s2987_s29   ;;  %s2250_s28 = sphi %s2331_s28, %s2986_s28   ;;  %s2246_s27 = sphi %s2329_s27, %s2985_s27  }
   0x5   : > { %s2354_s11 = sadd.s32 1, %s2258_s30   ;;  %s207_s12 = sadd.s32 1, %s2254_s29 }
   0x6   : > { %s204_s13 = ssub.s32 %s2258_s30, %s2354_s11  ;;  %p217_p0 = scmp.ne.s32.totalorder %s2254_s29, %s2250_s28 }
   0x7   : > { %p205_p1 = scmp.eq.s32.totalorder %s204_s13, 0  ;;  %p218_p2 = scmp.eq.s32.totalorder %s2350_s9, 1 }
   0x8   : > { %p223_p3 = scmp.ne.s32.totalorder %s2250_s28, %s2246_s27  ;;  %p224_p4 = scmp.eq.s32.totalorder %s1850_s10, 1 }
   0x9   : > { %s2365_s14 = scalar_select %p205_p1, %s2254_s29, %s207_s12  }
   0xa   : > { %p2367_p5 = por %p218_p2, %p217_p0  ;;  %p2371_p6 = por %p224_p4, %p223_p3 }
   0xb   : > { %p1851_p7 = scmp.ge.s32.totalorder %s2258_s30, 1  ;;  %p231_p8 = scmp.lt.s32.totalorder %s2258_s30, 3 }
   0xc   : > { %s2976_s15 = scalar_select %p2367_p5, 1, 0 }
   0xd   : > { %s2977_s16 = scalar_select %p2371_p6, 1, 0 }
   0xe   : > { %p2973_p9 = scmp.eq.s32.totalorder %s2350_s9, 0  ;;  %p2378_p10 = pnand %p1851_p7, %p231_p8 }
   0xf   : > { %s2260_s18 = smov [#allocation3]   ;;  %s2164_s23 = scalar_lea.hbm %s2971_s7, 8192 }
  0x10   : > { %s2978_s17 = scalar_select %p2378_p10, 1, 0 }
  0x11   : > { %s258_s19 = sshll.u32 %s2260_s18, 4  ;;  %p2024_p11 = pneg %p2378_p10  ;;  %s259_s19 = int_to_ptr.vmem [resolvable:$true] %s258_s19 }
  0x12   : > { %p2165_p13 = scmp.ne.s32.totalorder %s2971_s7, %s2164_s23  ;;  %p2171_p3 = scmp.lt.u32.totalorder %s2164_s23, %s2971_s7 }
  0x13   : > { %p2386_p12 = pnand %p2973_p9, %p2024_p11 }
  0x15   : > { %p2166_p0 = pneg %p2386_p12 }
  0x17   : > { %p2167_p1 = pnand %p2166_p0, %p2165_p13 }
  0x19   : > { %p2168_p2 = pneg %p2167_p1 }
  0x1b   : > { %p2173_p4 = pnand %p2171_p3, %p2168_p2 }
  0x1d   : > { %2176 = shalt.err (!%p2173_p4)
}
  0x1e   : > { %s2177_s12 = scalar_lea.vmem %s259_s19, 8192  ;;  %p2185_p9 = scmp.lt.s32.totalorder %s259_s19, %s259_s19 }
  0x1f   : > { %p2178_p7 = scmp.ne.s32.totalorder %s259_s19, %s2177_s12  ;;  %p2186_p6 = scmp.lt.s32.totalorder %s2177_s12, %s2177_s12 }
  0x21   : > { %p2180_p8 = pnand %p2178_p7, %p2166_p0  ;;  %p2187_p5 = por %p2186_p6, %p2185_p9 }
  0x23   : > { %p2181_p11 = pneg %p2180_p8 }
  0x25   : > { %p2188_p10 = pnand %p2187_p5, %p2181_p11 }
  0x27   : > { %2191 = shalt.err (!%p2188_p10)
}
  0x28   : > { %s2261_s13 = smov 256   ;;  %s2262_s18 = smov 16  }
  0x29   : > { %2027 = dma.hbm_to_vmem [thread:$0]  (!%p2386_p12), %s2971_s7, 8192, %s259_s19, [#allocation4], %s2261_s13, %s2261_s13, %s2262_s18  }
  0x2a   : > { %p2980_p13 = scmp.ne.s32.totalorder %s2978_s17, 0 }
  0x2b   : > { %p2981_p1 = scmp.eq.s32.totalorder (!%p2980_p13), %s2350_s9, 0 }
  0x2c   : > { %290 = sbr.rel (%p2980_p13) target bundleno = 1558 (0x616), region = 52 }
  0x33   : > { %2237 = dma.done.wait (%p2981_p1), [#allocation4], 8192   ;;  %p2982_p0 = pmov %p2981_p1 }
  0x34   : > { %p329_p5 = scmp.lt.s32.totalorder %s2350_s9, 1  ;;  %v2263_v0 = vmov 0.0   ;;  %v2264_v1 = vmov 0   ;;  %v975_v8 = vld [vmem:[%s2969_s5 + $0x8] sm:$0xff]  ;;  %v1365_v9 = vld [vmem:[#allocation3 + $0x8] sm:$0xff]  ;;  %v1364_v11 = vld [vmem:[#allocation3] sm:$0xff] }
  0x35   : > { %2239 = vsyncadd (%p2982_p0), [#allocation4], 4294959104  ;;  %1075 = vmatprep.mubr.f32.mxu1 %v2263_v0  ;;  %2090 = vset.pattern.permute.xlu0 %v2264_v1  ;;  %v1367_v10 = vld [vmem:[#allocation3 + $0x18] sm:$0xff]  ;;  %v1366_v12 = vld [vmem:[#allocation3 + $0x10] sm:$0xff]  ;;  %vm998_vm0 = vcmask 130048   ;;  %vm2265_vm5 = vmmov 0  }
  0x36   : > { %s2416_s20 = scalar_select %p329_p5, %s2350_s9, 1  ;;  %2091 = vset.pattern.permute.xlu1 %v2264_v1  ;;  %985 = vperm.xlu0 %2090, %v975_v8   ;;  %v970_v13 = vld [vmem:[%s2968_s4] sm:$0xff]  ;;  %v1954_v15 = vpack.c.bf16 %v1367_v10, %v1365_v9  ;;  %v1956_v16 = vpack.c.bf16 %v1366_v12, %v1364_v11  ;;  %v971_v17 = vld [vmem:[%s2968_s4 + $0x8] sm:$0xff]  ;;  %v1369_v18 = vld [vmem:[#allocation3 + $0x28] sm:$0xff]  ;;  %vm1582_vm6 = vcmask 523264   ;;  %vm1659_vm9 = vcmask 64512  }
  0x37   : > { %v974_v14 = vld [vmem:[%s2969_s5] sm:$0xff]  ;;  %v1371_v19 = vld [vmem:[#allocation3 + $0x38] sm:$0xff]  ;;  %v1368_v21 = vld [vmem:[#allocation3 + $0x20] sm:$0xff]  ;;  %s2268_s18 = smov 17   ;;  %vm339_vm10 = vcmask 138240   ;;  %vm342_vm11 = vcmask 277640  }
  0x38   : > { %s1873_s17 = sshll.u32 %s2416_s20, 5  ;;  %1955 = vmatprep.subr.bf16.mxu0 %v1954_v15  ;;  %v1958_v20 = vpack.c.bf16 %v1371_v19, %v1369_v18  ;;  %v1370_v22 = vld [vmem:[#allocation3 + $0x30] sm:$0xff]  ;;  %v1373_v24 = vld [vmem:[#allocation3 + $0x48] sm:$0xff]  ;;  %v1375_v25 = vld [vmem:[#allocation3 + $0x58] sm:$0xff]  ;;  %340 = vst.msk [vmem:[#allocation2] sm:$0xff] %vm339_vm10, %v2263_v0  ;;  %vm369_vm12 = vcmask 1047688  }
  0x39   : > { %s338_s24 = scalar_lea.vmem %s2965_s1, %s1873_s17  ;;  %1957 = vmatpush1.bf16.msra.mxu0 %v1956_v16  ;;  %v1960_v23 = vpack.c.bf16 %v1370_v22, %v1368_v21  ;;  %v1962_v26 = vpack.c.bf16 %v1375_v25, %v1373_v24  ;;  %v1372_v27 = vld [vmem:[#allocation3 + $0x40] sm:$0xff]  ;;  %v1374_v28 = vld [vmem:[#allocation3 + $0x50] sm:$0xff]  ;;  %v1377_v30 = vld [vmem:[#allocation3 + $0x68] sm:$0xff]  ;;  %s333_s13 = scalar_lea.vmem %s2964_s0, %s1873_s17  ;;  %341 = vst.msk [vmem:[#allocation2 + $0x18] sm:$0xff] %vm339_vm10, %v2263_v0  ;;  %vm465_vm15 = vcmask 916480  }
  0x3a   : > { %v967_v2 = vld [vmem:[%s338_s24 + $0x8] sm:$0xff]  ;;  %v969_v3 = vld [vmem:[%s338_s24 + $0x18] sm:$0xff]  ;;  %v966_v4 = vld [vmem:[%s338_s24] sm:$0xff]  ;;  %980 = vperm.xlu0 %2090, %v974_v14   ;;  %1959 = vmatprep.subr.bf16.mxu0 %v1958_v20  ;;  %v1964_v29 = vpack.c.bf16 %v1374_v28, %v1372_v27  ;;  %344 = vst.msk [vmem:[#allocation2 + $0x28] sm:$0xff] %vm342_vm11, %v2263_v0  ;;  %s2276_s19 = smov 112   ;;  %s2277_s23 = smov 96  }
  0x3b   : > { %v1918_v5 = vpack.c.bf16 %v969_v3, %v967_v2  ;;  %v968_v6 = vld [vmem:[%s338_s24 + $0x10] sm:$0xff]  ;;  %v1379_v31 = vld [vmem:[#allocation3 + $0x78] sm:$0xff]  ;;  %v1378_v34 = vld [vmem:[#allocation3 + $0x70] sm:$0xff]  ;;  %s2266_s24 = smov 64   ;;  %343 = vst.msk [vmem:[#allocation2 + $0x10] sm:$0xff] %vm342_vm11, %v2263_v0  ;;  %s2279_s20 = smov 127  }
  0x3c   : > { %v1920_v7 = vpack.c.bf16 %v968_v6, %v966_v4  ;;  %v1966_v32 = vpack.c.bf16 %v1379_v31, %v1377_v30  ;;  %v1376_v33 = vld [vmem:[#allocation3 + $0x60] sm:$0xff]  ;;  %v1381_v36 = vld [vmem:[#allocation3 + $0x88] sm:$0xff]  ;;  %v1383_v37 = vld [vmem:[#allocation3 + $0x98] sm:$0xff]  ;;  %s2280_s21 = smov 126   ;;  %s326_s17 = sand.u32 1, %s2250_s28  }
  0x3d   : > { %1919 = vmatprep.subr.bf16.mxu1 %v1918_v5  ;;  %1961 = vmatpush1.bf16.msra.mxu0 %v1960_v23  ;;  %v1968_v35 = vpack.c.bf16 %v1378_v34, %v1376_v33  ;;  %v1970_v38 = vpack.c.bf16 %v1383_v37, %v1381_v36  ;;  %v1380_v39 = vld [vmem:[#allocation3 + $0x80] sm:$0xff]  ;;  %v1382_v40 = vld [vmem:[#allocation3 + $0x90] sm:$0xff]  ;;  %v1385_v42 = vld [vmem:[#allocation3 + $0xa8] sm:$0xff]  ;;  %s1856_s22 = sshll.u32 %s326_s17, 6  ;;  %p2983_p9 = scmp.ne.s32.totalorder %s2976_s15, 0 }
  0x3e   : > { %1921 = vmatpush1.bf16.msra.mxu1 %v1920_v7  ;;  %1963 = vmatprep.subr.bf16.mxu0 %v1962_v26  ;;  %v1972_v41 = vpack.c.bf16 %v1382_v40, %v1380_v39  ;;  %v1387_v43 = vld [vmem:[#allocation3 + $0xb8] sm:$0xff]  ;;  %v1384_v45 = vld [vmem:[#allocation3 + $0xa0] sm:$0xff]  ;;  %v1386_v46 = vld [vmem:[#allocation3 + $0xb0] sm:$0xff] }
  0x3f   : > { %v1974_v44 = vpack.c.bf16 %v1387_v43, %v1385_v42  ;;  %v1976_v47 = vpack.c.bf16 %v1386_v46, %v1384_v45  ;;  %v1389_v48 = vld [vmem:[#allocation3 + $0xc8] sm:$0xff]  ;;  %v1391_v49 = vld [vmem:[#allocation3 + $0xd8] sm:$0xff]  ;;  %v1388_v51 = vld [vmem:[#allocation3 + $0xc0] sm:$0xff] }
  0x40   : > { %v1978_v50 = vpack.c.bf16 %v1391_v49, %v1389_v48  ;;  %v1390_v52 = vld [vmem:[#allocation3 + $0xd0] sm:$0xff]  ;;  %v1349_v55 = vld [vmem:[%s2970_s6 + $0x88] sm:$0xff]  ;;  %v1393_v56 = vld [vmem:[#allocation3 + $0xe8] sm:$0xff] }
  0x41   : > { %1861 = vmatmul.mubr.msk.f32.vlgmr.msra.gmra.mrb[0].mxu1 %vm998_vm0, %v970_v13  ;;  %1965 = vmatpush1.bf16.msra.mxu0 %v1964_v29  ;;  %v1980_v53 = vpack.c.bf16 %v1390_v52, %v1388_v51  ;;  %v1348_v54 = vld [vmem:[%s2970_s6 + $0x80] sm:$0xff]  ;;  %v1395_v58 = vld [vmem:[#allocation3 + $0xf8] sm:$0xff]  ;;  %v1392_v63 = vld [vmem:[#allocation3 + $0xe0] sm:$0xff] }
  0x42   : > { %1081 = vmatprep.mubr.f32.mxu1 %v2263_v0  ;;  %1967 = vmatprep.subr.bf16.mxu0 %v1966_v32  ;;  %v1922_v57 = vpack.c.bf16 %v1349_v55, %v1348_v54  ;;  %v1332_v59 = vld [vmem:[%s2970_s6] sm:$0xff]  ;;  %v1333_v60 = vld [vmem:[%s2970_s6 + $0x8] sm:$0xff]  ;;  %v1982_v61 = vpack.c.bf16 %v1395_v58, %v1393_v56  ;;  %v1350_v4 = vld [vmem:[%s2970_s6 + $0x90] sm:$0xff] }
  0x43   : > { %v1924_v62 = vpack.c.bf16 %v1333_v60, %v1332_v59  ;;  %v1394_v2 = vld [vmem:[#allocation3 + $0xf0] sm:$0xff]  ;;  %v1351_v5 = vld [vmem:[%s2970_s6 + $0x98] sm:$0xff]  ;;  %v1399_v8 = vld [vmem:[#allocation3 + $0x118] sm:$0xff] }
  0x44   : > { %1923 = vmatprep.subr.bf16.mxu1 %v1922_v57  ;;  %v1984_v3 = vpack.c.bf16 %v1394_v2, %v1392_v63  ;;  %v1397_v6 = vld [vmem:[#allocation3 + $0x108] sm:$0xff]  ;;  %v1926_v7 = vpack.c.bf16 %v1351_v5, %v1350_v4  ;;  %v1334_v9 = vld [vmem:[%s2970_s6 + $0x10] sm:$0xff]  ;;  %v1398_v14 = vld [vmem:[#allocation3 + $0x110] sm:$0xff] }
  0x45   : > { %1862 = vmatmul.mubr.msk.f32.gmra.mrb[2].mxu1 %vm998_vm0, %v971_v17  ;;  %1969 = vmatpush1.bf16.msra.mxu0 %v1968_v35  ;;  %v1335_v10 = vld [vmem:[%s2970_s6 + $0x18] sm:$0xff]  ;;  %v1986_v11 = vpack.c.bf16 %v1399_v8, %v1397_v6  ;;  %v1396_v13 = vld [vmem:[#allocation3 + $0x100] sm:$0xff]  ;;  %v1352_v16 = vld [vmem:[%s2970_s6 + $0xa0] sm:$0xff] }
  0x46   : > { %1087 = vmatprep.mubr.f32.mxu1 %v2263_v0  ;;  %1971 = vmatprep.subr.bf16.mxu0 %v1970_v38  ;;  %v1928_v12 = vpack.c.bf16 %v1335_v10, %v1334_v9  ;;  %v1988_v15 = vpack.c.bf16 %v1398_v14, %v1396_v13  ;;  %v1353_v17 = vld [vmem:[%s2970_s6 + $0xa8] sm:$0xff]  ;;  %v1401_v18 = vld [vmem:[#allocation3 + $0x128] sm:$0xff]  ;;  %v1336_v21 = vld [vmem:[%s2970_s6 + $0x20] sm:$0xff] }
  0x47   : > { %1925 = vmatpush3.bf16.msra.mxu1 %v1924_v62  ;;  %v1930_v19 = vpack.c.bf16 %v1353_v17, %v1352_v16  ;;  %v1403_v20 = vld [vmem:[#allocation3 + $0x138] sm:$0xff]  ;;  %v1400_v25 = vld [vmem:[#allocation3 + $0x120] sm:$0xff]  ;;  %v1402_v26 = vld [vmem:[#allocation3 + $0x130] sm:$0xff] }
  0x48   : > { %1927 = vmatprep.subr.bf16.mxu1 %v1926_v7  ;;  %v1337_v22 = vld [vmem:[%s2970_s6 + $0x28] sm:$0xff]  ;;  %v1990_v23 = vpack.c.bf16 %v1403_v20, %v1401_v18  ;;  %v1992_v27 = vpack.c.bf16 %v1402_v26, %v1400_v25  ;;  %v1354_v28 = vld [vmem:[%s2970_s6 + $0xb0] sm:$0xff]  ;;  %v1355_v29 = vld [vmem:[%s2970_s6 + $0xb8] sm:$0xff] }
  0x49   : > { %1973 = vmatpush1.bf16.msra.mxu0 %v1972_v41  ;;  %v1932_v24 = vpack.c.bf16 %v1337_v22, %v1336_v21  ;;  %v1405_v30 = vld [vmem:[#allocation3 + $0x148] sm:$0xff]  ;;  %v1934_v31 = vpack.c.bf16 %v1355_v29, %v1354_v28  ;;  %v1407_v32 = vld [vmem:[#allocation3 + $0x158] sm:$0xff]  ;;  %v1338_v33 = vld [vmem:[%s2970_s6 + $0x30] sm:$0xff] }
  0x4a   : > { %1975 = vmatprep.subr.bf16.mxu0 %v1974_v44  ;;  %v1339_v34 = vld [vmem:[%s2970_s6 + $0x38] sm:$0xff]  ;;  %v1994_v35 = vpack.c.bf16 %v1407_v32, %v1405_v30  ;;  %v1404_v37 = vld [vmem:[#allocation3 + $0x140] sm:$0xff]  ;;  %v1406_v38 = vld [vmem:[#allocation3 + $0x150] sm:$0xff] }
  0x4b   : > { %1929 = vmatpush3.bf16.msra.mxu1 %v1928_v12  ;;  %v1936_v36 = vpack.c.bf16 %v1339_v34, %v1338_v33  ;;  %v1996_v39 = vpack.c.bf16 %v1406_v38, %v1404_v37  ;;  %v1356_v40 = vld [vmem:[%s2970_s6 + $0xc0] sm:$0xff]  ;;  %v1357_v41 = vld [vmem:[%s2970_s6 + $0xc8] sm:$0xff]  ;;  %v1409_v42 = vld [vmem:[#allocation3 + $0x168] sm:$0xff] }
  0x4c   : > { %1931 = vmatprep.subr.bf16.mxu1 %v1930_v19  ;;  %v1938_v43 = vpack.c.bf16 %v1357_v41, %v1356_v40  ;;  %v1411_v44 = vld [vmem:[#allocation3 + $0x178] sm:$0xff]  ;;  %v1340_v45 = vld [vmem:[%s2970_s6 + $0x40] sm:$0xff]  ;;  %v1408_v49 = vld [vmem:[#allocation3 + $0x160] sm:$0xff] }
  0x4d   : > { %1977 = vmatpush1.bf16.msra.mxu0 %v1976_v47  ;;  %v1341_v46 = vld [vmem:[%s2970_s6 + $0x48] sm:$0xff]  ;;  %v1998_v47 = vpack.c.bf16 %v1411_v44, %v1409_v42  ;;  %v1358_v52 = vld [vmem:[%s2970_s6 + $0xd0] sm:$0xff]  ;;  %v1413_v54 = vld [vmem:[#allocation3 + $0x188] sm:$0xff] }
  0x4e   : > { %1979 = vmatprep.subr.bf16.mxu0 %v1978_v50  ;;  %v1940_v48 = vpack.c.bf16 %v1341_v46, %v1340_v45  ;;  %v1410_v50 = vld [vmem:[#allocation3 + $0x170] sm:$0xff]  ;;  %v1415_v56 = vld [vmem:[#allocation3 + $0x198] sm:$0xff]  ;;  %v1342_v57 = vld [vmem:[%s2970_s6 + $0x50] sm:$0xff] }
  0x4f   : > { %1933 = vmatpush3.bf16.msra.mxu1 %v1932_v24  ;;  %v2000_v51 = vpack.c.bf16 %v1410_v50, %v1408_v49  ;;  %v1343_v58 = vld [vmem:[%s2970_s6 + $0x58] sm:$0xff]  ;;  %v2002_v59 = vpack.c.bf16 %v1415_v56, %v1413_v54  ;;  %v1414_v62 = vld [vmem:[#allocation3 + $0x190] sm:$0xff]  ;;  %v1419_v6 = vld [vmem:[#allocation3 + $0x1b8] sm:$0xff] }
  0x50   : > { %1935 = vmatprep.subr.bf16.mxu1 %v1934_v31  ;;  %v1944_v60 = vpack.c.bf16 %v1343_v58, %v1342_v57  ;;  %v1360_v2 = vld [vmem:[%s2970_s6 + $0xe0] sm:$0xff]  ;;  %v1417_v4 = vld [vmem:[#allocation3 + $0x1a8] sm:$0xff]  ;;  %v1345_v8 = vld [vmem:[%s2970_s6 + $0x68] sm:$0xff] }
  0x51   : > { %1981 = vmatpush1.bf16.msra.mxu0 %v1980_v53  ;;  %v1359_v53 = vld [vmem:[%s2970_s6 + $0xd8] sm:$0xff]  ;;  %v1344_v7 = vld [vmem:[%s2970_s6 + $0x60] sm:$0xff]  ;;  %v972_v9 = vld [vmem:[%s2968_s4 + $0x10] sm:$0xff]  ;;  %v2006_v10 = vpack.c.bf16 %v1419_v6, %v1417_v4 }
  0x52   : > { %1983 = vmatprep.subr.bf16.mxu0 %v1982_v61  ;;  %v1942_v55 = vpack.c.bf16 %v1359_v53, %v1358_v52  ;;  %v1412_v61 = vld [vmem:[#allocation3 + $0x180] sm:$0xff]  ;;  %v1418_v13 = vld [vmem:[#allocation3 + $0x1b0] sm:$0xff]  ;;  %1863 = vmatmul.mubr.msk.f32.gmra.mrb[4].mxu1 %vm998_vm0, %v972_v9  ;;  %v1363_v16 = vld [vmem:[%s2970_s6 + $0xf8] sm:$0xff] }
  0x53   : > { %1937 = vmatpush3.bf16.msra.mxu1 %v1936_v36  ;;  %v2004_v63 = vpack.c.bf16 %v1414_v62, %v1412_v61  ;;  %v1416_v12 = vld [vmem:[#allocation3 + $0x1a0] sm:$0xff]  ;;  %v1421_v17 = vld [vmem:[#allocation3 + $0x1c8] sm:$0xff]  ;;  %1093 = vmatprep.mubr.f32.mxu1 %v2263_v0  ;;  %v1423_v19 = vld [vmem:[#allocation3 + $0x1d8] sm:$0xff] }
  0x54   : > { %1939 = vmatprep.subr.bf16.mxu1 %v1938_v43  ;;  %v2008_v14 = vpack.c.bf16 %v1418_v13, %v1416_v12  ;;  %v1346_v20 = vld [vmem:[%s2970_s6 + $0x70] sm:$0xff]  ;;  %v1347_v21 = vld [vmem:[%s2970_s6 + $0x78] sm:$0xff]  ;;  %v1422_v26 = vld [vmem:[#allocation3 + $0x1d0] sm:$0xff] }
  0x55   : > { %1985 = vmatpush1.bf16.msra.mxu0 %v1984_v3  ;;  %v1361_v3 = vld [vmem:[%s2970_s6 + $0xe8] sm:$0xff]  ;;  %v973_v22 = vld [vmem:[%s2968_s4 + $0x18] sm:$0xff]  ;;  %v1952_v24 = vpack.c.bf16 %v1347_v21, %v1346_v20  ;;  %v1420_v25 = vld [vmem:[#allocation3 + $0x1c0] sm:$0xff] }
  0x56   : > { %1987 = vmatprep.subr.bf16.mxu0 %v1986_v11  ;;  %v1946_v5 = vpack.c.bf16 %v1361_v3, %v1360_v2  ;;  %v1948_v11 = vpack.c.bf16 %v1345_v8, %v1344_v7  ;;  %1864 = vmatmul.mubr.msk.f32.gmra.mrb[6].mxu1 %vm998_vm0, %v973_v22  ;;  %v1425_v28 = vld [vmem:[#allocation3 + $0x1e8] sm:$0xff]  ;;  %v1427_v29 = vld [vmem:[#allocation3 + $0x1f8] sm:$0xff]  ;;  %v1424_v31 = vld [vmem:[#allocation3 + $0x1e0] sm:$0xff]  ;;  %vm510_vm0 = vcmask 785408  }
  0x57   : > { %1941 = vmatpush3.bf16.msra.mxu1 %v1940_v48  ;;  %v2014_v30 = vpack.c.bf16 %v1427_v29, %v1425_v28  ;;  %v1426_v32 = vld [vmem:[#allocation3 + $0x1f0] sm:$0xff] }
  0x58   : > { %1943 = vmatprep.subr.bf16.mxu1 %v1942_v55  ;;  %v2016_v33 = vpack.c.bf16 %v1426_v32, %v1424_v31 }
  0x59   : > { %1989 = vmatpush1.bf16.msra.mxu0 %v1988_v15  ;;  %v1362_v15 = vld [vmem:[%s2970_s6 + $0xf0] sm:$0xff] }
  0x5a   : > { %1991 = vmatprep.subr.bf16.mxu0 %v1990_v23  ;;  %v1950_v18 = vpack.c.bf16 %v1363_v16, %v1362_v15  ;;  %v2010_v23 = vpack.c.bf16 %v1423_v19, %v1421_v17 }
  0x5b   : > { %1945 = vmatpush3.bf16.msra.mxu1 %v1944_v60 }
  0x5c   : > { %1947 = vmatprep.subr.bf16.mxu1 %v1946_v5 }
  0x5d   : > { %1993 = vmatpush1.bf16.msra.mxu0 %v1992_v27  ;;  %v2012_v27 = vpack.c.bf16 %v1422_v26, %v1420_v25 }
  0x5e   : > { %1995 = vmatprep.subr.bf16.mxu0 %v1994_v35 }
  0x5f   : > { %1949 = vmatpush3.bf16.msra.mxu1 %v1948_v11 }
  0x60   : > { %1951 = vmatprep.subr.bf16.mxu1 %v1950_v18 }
  0x61   : > { %1997 = vmatpush1.bf16.msra.mxu0 %v1996_v39 }
  0x62   : > { %1999 = vmatprep.subr.bf16.mxu0 %v1998_v47 }
  0x63   : > { %1953 = vmatpush3.bf16.msra.mxu1 %v1952_v24 }
  0x64   : > { %1913 = vmatprep.subr.mxu1 %v2263_v0 }
  0x65   : > { %2001 = vmatpush1.bf16.msra.mxu0 %v2000_v51 }
  0x66   : > { %2003 = vmatprep.subr.bf16.mxu0 %v2002_v59 }
  0x69   : > { %2005 = vmatpush1.bf16.msra.mxu0 %v2004_v63 }
  0x6a   : > { %2007 = vmatprep.subr.bf16.mxu0 %v2006_v10 }
  0x6d   : > { %2009 = vmatpush1.bf16.msra.mxu0 %v2008_v14 }
  0x6e   : > { %2011 = vmatprep.subr.bf16.mxu0 %v2010_v23 }
  0x71   : > { %2013 = vmatpush1.bf16.msra.mxu0 %v2012_v27 }
  0x72   : > { %2015 = vmatprep.subr.bf16.mxu0 %v2014_v30 }
  0x75   : > { %2017 = vmatpush1.bf16.msra.mxu0 %v2016_v33 }
  0xb5   : > { %v986_v34 = vpop.permute.xlu0 %985 }
  0xb9   : > { %v981_v35 = vpop.permute.xlu0 %980 }
 0x114   : > { %v1077_v36 = vpop.f32.mrb[0].mxu1 }
 0x115   : > { %v2547_v37 = vadd.f32 %v1077_v36, %v981_v35  ;;  %v1079_v38 = vpop.f32.mrb[1].mxu1 }
 0x116   : > { %v2549_v39 = vadd.f32 %v1079_v38, %v981_v35 }
 0x117   : > { %v2552_v40 = vmul.f32 0.70710677, %v2547_v37 }
 0x118   : > { %v2555_v41 = vmul.f32 0.70710677, %v2549_v39  ;;  %v1083_v42 = vpop.f32.mrb[2].mxu1 }
 0x119   : > { %v1116_v43 = vand.u32 2147483647, %v2552_v40  ;;  %v2558_v44 = vadd.f32 %v1083_v42, %v986_v34  ;;  %v1085_v45 = vpop.f32.mrb[3].mxu1  ;;  %vm1292_vm1 = vcmp.ge.f32.partialorder %v2552_v40, 0.0 }
 0x11a   : > { %v1117_v46 = vand.u32 2147483647, %v2555_v41  ;;  %v2561_v47 = vadd.f32 %v1085_v45, %v986_v34  ;;  %vm1293_vm2 = vcmp.ge.f32.partialorder %v2555_v41, 0.0 }
 0x11b   : > { %v1124_v48 = vmul.f32 0.3275911, %v1116_v43  ;;  %v2564_v49 = vmul.f32 0.70710677, %v2558_v44  ;;  %v1244_v63 = vsub.f32 0.0, %v1116_v43 }
 0x11c   : > { %v1125_v50 = vmul.f32 0.3275911, %v1117_v46  ;;  %v2567_v51 = vmul.f32 0.70710677, %v2561_v47  ;;  %v1245_v4 = vsub.f32 0.0, %v1117_v46 }
 0x11d   : > { %v1132_v52 = vadd.f32 1.0, %v1124_v48  ;;  %v1118_v53 = vand.u32 2147483647, %v2564_v49  ;;  %v1252_v10 = vmul.f32 %v1244_v63, %v1116_v43  ;;  %vm1294_vm3 = vcmp.ge.f32.partialorder %v2564_v49, 0.0 }
 0x11e   : > { %v1133_v54 = vadd.f32 1.0, %v1125_v50  ;;  %v1119_v55 = vand.u32 2147483647, %v2567_v51  ;;  %v1253_v15 = vmul.f32 %v1245_v4, %v1117_v46  ;;  %vm1295_vm4 = vcmp.ge.f32.partialorder %v2567_v51, 0.0 }
 0x11f   : > { %2112 = vrcp.f32 %v1132_v52  ;;  %v1126_v56 = vmul.f32 0.3275911, %v1118_v53  ;;  %v1246_v12 = vsub.f32 0.0, %v1118_v53  ;;  %v1260_v22 = vmul.f32 1.442695, %v1252_v10 }
 0x120   : > { %2114 = vrcp.f32 %v1133_v54  ;;  %v1127_v57 = vmul.f32 0.3275911, %v1119_v55  ;;  %v1247_v17 = vsub.f32 0.0, %v1119_v55  ;;  %v1262_v27 = vmul.f32 1.442695, %v1253_v15 }
 0x121   : > { %v1134_v58 = vadd.f32 1.0, %v1126_v56  ;;  %v1254_v23 = vmul.f32 %v1246_v12, %v1118_v53 }
 0x122   : > { %v1135_v59 = vadd.f32 1.0, %v1127_v57  ;;  %v1255_v28 = vmul.f32 %v1247_v17, %v1119_v55 }
 0x123   : > { %2116 = vrcp.f32 %v1134_v58  ;;  %v1264_v34 = vmul.f32 1.442695, %v1254_v23 }
 0x124   : > { %2118 = vrcp.f32 %v1135_v59  ;;  %v1266_v42 = vmul.f32 1.442695, %v1255_v28 }
 0x125   : > { %2120 = vpow2.f32 %v1260_v22 }
 0x126   : > { %2122 = vpow2.f32 %v1262_v27  ;;  %v1101_v27 = vmul.f32 0.5, %v2549_v39  ;;  %v1102_v39 = vmul.f32 0.5, %v2558_v44 }
 0x127   : > { %2124 = vpow2.f32 %v1264_v34 }
 0x128   : > { %2126 = vpow2.f32 %v1266_v42 }
 0x129   : > { %v2113_v60 = vpop.eup %2112 }
 0x12a   : > { %v2115_v61 = vpop.eup %2114  ;;  %v1148_v62 = vmul.f32 %v2113_v60, %v1132_v52 }
 0x12b   : > { %v1149_v2 = vmul.f32 %v2115_v61, %v1133_v54 }
 0x12c   : > { %v1156_v3 = vsub.f32 2.0, %v1148_v62 }
 0x12d   : > { %v2117_v5 = vpop.eup %2116  ;;  %v1157_v6 = vsub.f32 2.0, %v1149_v2 }
 0x12e   : > { %v2119_v7 = vpop.eup %2118  ;;  %v1164_v8 = vmul.f32 %v2113_v60, %v1156_v3  ;;  %v1150_v9 = vmul.f32 %v2117_v5, %v1134_v58 }
 0x12f   : > { %v1165_v11 = vmul.f32 %v2115_v61, %v1157_v6  ;;  %v1151_v13 = vmul.f32 %v2119_v7, %v1135_v59  ;;  %v2121_v2 = vpop.eup %2120 }
 0x130   : > { %v1172_v14 = vmul.f32 1.0614054, %v1164_v8  ;;  %v1158_v16 = vsub.f32 2.0, %v1150_v9 }
 0x131   : > { %v1159_v18 = vsub.f32 2.0, %v1151_v13  ;;  %v1173_v19 = vmul.f32 1.0614054, %v1165_v11 }
 0x132   : > { %v1180_v20 = vadd.f32 -1.4531521, %v1172_v14  ;;  %v1166_v21 = vmul.f32 %v2117_v5, %v1158_v16  ;;  %v2123_v5 = vpop.eup %2122 }
 0x133   : > { %v1167_v24 = vmul.f32 %v2119_v7, %v1159_v18  ;;  %v1181_v25 = vadd.f32 -1.4531521, %v1173_v19  ;;  %v2125_v14 = vpop.eup %2124 }
 0x134   : > { %v1188_v26 = vmul.f32 %v1180_v20, %v1164_v8  ;;  %v1174_v29 = vmul.f32 1.0614054, %v1166_v21  ;;  %v2127_v17 = vpop.eup %2126 }
 0x135   : > { %v1189_v30 = vmul.f32 %v1181_v25, %v1165_v11  ;;  %v1175_v31 = vmul.f32 1.0614054, %v1167_v24 }
 0x136   : > { %v1196_v32 = vadd.f32 1.4214138, %v1188_v26  ;;  %v1182_v33 = vadd.f32 -1.4531521, %v1174_v29 }
 0x137   : > { %v1197_v35 = vadd.f32 1.4214138, %v1189_v30  ;;  %v1183_v36 = vadd.f32 -1.4531521, %v1175_v31 }
 0x138   : > { %v1204_v38 = vmul.f32 %v1196_v32, %v1164_v8  ;;  %v1190_v43 = vmul.f32 %v1182_v33, %v1166_v21  ;;  %v1103_v33 = vmul.f32 0.5, %v2561_v47 }
 0x139   : > { %v1205_v45 = vmul.f32 %v1197_v35, %v1165_v11  ;;  %v1191_v46 = vmul.f32 %v1183_v36, %v1167_v24 }
 0x13a   : > { %v1212_v48 = vadd.f32 -0.28449672, %v1204_v38  ;;  %v1198_v50 = vadd.f32 1.4214138, %v1190_v43 }
 0x13b   : > { %v1213_v52 = vadd.f32 -0.28449672, %v1205_v45  ;;  %v1199_v53 = vadd.f32 1.4214138, %v1191_v46  ;;  %v976_v46 = vld [vmem:[%s2969_s5 + $0x10] sm:$0xff] }
 0x13c   : > { %v1220_v54 = vmul.f32 %v1212_v48, %v1164_v8  ;;  %v1206_v55 = vmul.f32 %v1198_v50, %v1166_v21 }
 0x13d   : > { %v1221_v56 = vmul.f32 %v1213_v52, %v1165_v11  ;;  %v1207_v57 = vmul.f32 %v1199_v53, %v1167_v24 }
 0x13e   : > { %v1228_v58 = vadd.f32 0.2548296, %v1220_v54  ;;  %v1214_v59 = vadd.f32 -0.28449672, %v1206_v55 }
 0x13f   : > { %v1229_v60 = vadd.f32 0.2548296, %v1221_v56  ;;  %v1215_v61 = vadd.f32 -0.28449672, %v1207_v57 }
 0x140   : > { %v1236_v62 = vmul.f32 %v1228_v58, %v1164_v8  ;;  %v1222_v63 = vmul.f32 %v1214_v59, %v1166_v21 }
 0x141   : > { %v1237_v3 = vmul.f32 %v1229_v60, %v1165_v11  ;;  %v1223_v4 = vmul.f32 %v1215_v61, %v1167_v24 }
 0x142   : > { %v1276_v6 = vmul.f32 %v2121_v2, %v1236_v62  ;;  %v1230_v7 = vadd.f32 0.2548296, %v1222_v63 }
 0x143   : > { %v1277_v9 = vmul.f32 %v2123_v5, %v1237_v3  ;;  %v1231_v10 = vadd.f32 0.2548296, %v1223_v4 }
 0x144   : > { %v1284_v12 = vsub.f32 1.0, %v1276_v6  ;;  %v1238_v13 = vmul.f32 %v1230_v7, %v1166_v21 }
 0x145   : > { %v1285_v15 = vsub.f32 1.0, %v1277_v9  ;;  %v1239_v16 = vmul.f32 %v1231_v10, %v1167_v24  ;;  %v1100_v24 = vmul.f32 0.5, %v2547_v37  ;;  %v1089_v37 = vpop.f32.mrb[4].mxu1 }
 0x146   : > { %v1300_v18 = vsub.f32 0.0, %v1284_v12  ;;  %v1278_v19 = vmul.f32 %v2125_v14, %v1238_v13  ;;  %v1091_v49 = vpop.f32.mrb[5].mxu1 }
 0x147   : > { %v1301_v8 = vsub.f32 0.0, %v1285_v15  ;;  %v1279_v20 = vmul.f32 %v2127_v17, %v1239_v16  ;;  %v2579_v38 = vpop.f32.mrb[6].mxu1 }
 0x148   : > { %v1308_v22 = vsel %vm1292_vm1, %v1284_v12, %v1300_v18  ;;  %v1286_v11 = vsub.f32 1.0, %v1278_v19  ;;  %v2581_v51 = vpop.f32.mrb[7].mxu1  ;;  %vm788_vm1 = vcmask 15360  }
 0x149   : > { %v1316_v23 = vadd.f32 1.0, %v1308_v22  ;;  %v1309_v25 = vsel %vm1293_vm2, %v1285_v15, %v1301_v8  ;;  %v1287_v26 = vsub.f32 1.0, %v1279_v20 }
 0x14a   : > { %v1317_v21 = vadd.f32 1.0, %v1309_v25  ;;  %v1302_v28 = vsub.f32 0.0, %v1286_v11 }
 0x14b   : > { %v1303_v29 = vsub.f32 0.0, %v1287_v26  ;;  %v1324_v31 = vmul.f32 %v1316_v23, %v1100_v24 }
 0x14c   : > { %v1325_v30 = vmul.f32 %v1317_v21, %v1101_v27  ;;  %v1310_v40 = vsel %vm1294_vm3, %v1286_v11, %v1302_v28 }
 0x14d   : > { %v1311_v32 = vsel %vm1295_vm4, %v1287_v26, %v1303_v29  ;;  %v1318_v41 = vadd.f32 1.0, %v1310_v40 }
 0x14e   : > { %1494 = vmatprep.mubr.f32.mxu1 %v1325_v30  ;;  %v1319_v34 = vadd.f32 1.0, %v1311_v32 }
 0x14f   : > { %1495 = vmatmul.mubr.f32.vlgmr.msra.gmra.mrb[8].mxu1 %v1324_v31  ;;  %v1326_v36 = vmul.f32 %v1318_v41, %v1102_v39 }
 0x150   : > { %v1327_v35 = vmul.f32 %v1319_v34, %v1103_v33  ;;  %1915 = vmatprep.mubr.msk.f32.mxu1 %vm2265_vm5, %v2263_v0  ;;  %vm659_vm5 = vcmask 1039360  }
 0x152   : > { %1564 = vmatprep.mubr.f32.mxu0 %v1327_v35 }
 0x153   : > { %1565 = vmatmul.mubr.f32.vlgmr.msra.gmra.mrb[0].mxu0 %v1326_v36 }
 0x222   : > { %v1908_v42 = vpop.f32.mrb[8].mxu1 }
 0x223   : > { %v1909_v43 = vpop.f32.mrb[9].mxu1 }
 0x224   : > { %v1910_v47 = vadd.f32 %v1909_v43, %v1908_v42 }
 0x226   : > { %v1566_v45 = vpop.f32.mrb[0].mxu0  ;;  %1914 = vmatpush3.xpose.msk.msra.mxu1 %vm1582_vm6, %v1910_v47 }
 0x227   : > { %1572 = vrot.lane.b32.xlu1 %v1566_v45, %s2266_s24  ;;  %v1568_v44 = vpop.f32.mrb[1].mxu0 }
 0x22b   : > { %1577 = vrot.lane.b32.xlu1 %v1568_v44, %s2266_s24  ;;  %s2278_s24 = smov 2  }
 0x22f   : > { %990 = vperm.xlu1 %2091, %v976_v46  }
 0x299   : > { %v1573_v48 = vpop.permute.xlu1 %1572 }
 0x29a   : > { %v1575_v52 = vmax.f32 %v1566_v45, %v1573_v48 }
 0x29d   : > { %v1578_v50 = vpop.permute.xlu1 %1577 }
 0x29e   : > { %v1580_v53 = vmax.f32 %v1568_v44, %v1578_v50 }
 0x2a0   : > { %v1581_v54 = vmax.f32 %v1575_v52, %v1580_v53 }
 0x2a2   : > { %1916 = vmatmul.mubr.msk.f32.vlgmr.msra.gmra.mrb[10].mxu1 %vm1582_vm6, %v1581_v54  ;;  %v2267_v54 = vmov 4  }
 0x2a3   : > { %1741 = vmatprep.mubr.f32.mxu1 %v2263_v0  ;;  %2093 = vset.pattern.permute.xlu0 %v2267_v54 }
 0x2a4   : > { %2092 = vset.pattern.permute.xlu1 %v2267_v54 }
 0x2ae   : > { %v991_v55 = vpop.permute.xlu1 %990 }
 0x2af   : > { %v1090_v56 = vadd.f32 %v1089_v37, %v991_v55  ;;  %v1092_v57 = vadd.f32 %v1091_v49, %v991_v55  ;;  %v346_v55 = vld [vmem:[%s333_s13 + $0x8] sm:$0xff] }
 0x2b0   : > { %355 = vrot.lane.b32.xlu1 %v346_v55, %s2268_s18 }
 0x2b1   : > { %v1112_v58 = vmul.f32 0.70710677, %v1090_v56  ;;  %v1113_v59 = vmul.f32 0.70710677, %v1092_v57  ;;  %v1104_v45 = vmul.f32 0.5, %v1090_v56  ;;  %v1105_v48 = vmul.f32 0.5, %v1092_v57 }
 0x2b3   : > { %v1120_v60 = vand.u32 2147483647, %v1112_v58  ;;  %v1121_v61 = vand.u32 2147483647, %v1113_v59  ;;  %vm1296_vm7 = vcmp.ge.f32.partialorder %v1112_v58, 0.0  ;;  %vm1297_vm8 = vcmp.ge.f32.partialorder %v1113_v59, 0.0 }
 0x2b4   : > { %v345_v59 = vld [vmem:[%s333_s13] sm:$0xff] }
 0x2b5   : > { %v1128_v62 = vmul.f32 0.3275911, %v1120_v60  ;;  %v1129_v63 = vmul.f32 0.3275911, %v1121_v61  ;;  %v1248_v9 = vsub.f32 0.0, %v1120_v60  ;;  %v1249_v12 = vsub.f32 0.0, %v1121_v61 }
 0x2b7   : > { %v1136_v2 = vadd.f32 1.0, %v1128_v62  ;;  %v1137_v3 = vadd.f32 1.0, %v1129_v63  ;;  %v1256_v16 = vmul.f32 %v1248_v9, %v1120_v60  ;;  %v1257_v18 = vmul.f32 %v1249_v12, %v1121_v61  ;;  %v347_v60 = vld [vmem:[%s333_s13 + $0x10] sm:$0xff]  ;;  %v348_v61 = vld [vmem:[%s333_s13 + $0x18] sm:$0xff]  ;;  %v2597_v62 = vld [vmem:[%s2966_s2 + $0x8] sm:$0xff]  ;;  %s2281_s13 = smov [#allocation6]  }
 0x2b8   : > { %v2603_v63 = vld [vmem:[%s2966_s2] sm:$0xff] }
 0x2b9   : > { %2128 = vrcp.f32 %v1136_v2  ;;  %v1268_v20 = vmul.f32 1.442695, %v1256_v16  ;;  %v1270_v23 = vmul.f32 1.442695, %v1257_v18 }
 0x2ba   : > { %2130 = vrcp.f32 %v1137_v3 }
 0x2bb   : > { %2132 = vpow2.f32 %v1268_v20  ;;  %v2275_v20 = vmov 2  }
 0x2bc   : > { %2134 = vpow2.f32 %v1270_v23 }
 0x2c3   : > { %v2129_v4 = vpop.eup %2128 }
 0x2c4   : > { %v2131_v5 = vpop.eup %2130  ;;  %v1152_v6 = vmul.f32 %v2129_v4, %v1136_v2  ;;  %v2269_v2 = vmov 7  }
 0x2c5   : > { %v1153_v7 = vmul.f32 %v2131_v5, %v1137_v3  ;;  %v2133_v33 = vpop.eup %2132  ;;  %v2270_v3 = vmov 8  }
 0x2c6   : > { %v1160_v10 = vsub.f32 2.0, %v1152_v6  ;;  %v2135_v39 = vpop.eup %2134 }
 0x2c7   : > { %v1161_v13 = vsub.f32 2.0, %v1153_v7 }
 0x2c8   : > { %v1168_v14 = vmul.f32 %v2129_v4, %v1160_v10  ;;  %v2271_v4 = vmov 6  }
 0x2c9   : > { %v1169_v15 = vmul.f32 %v2131_v5, %v1161_v13  ;;  %v2272_v5 = vmov 1  }
 0x2ca   : > { %v1176_v17 = vmul.f32 1.0614054, %v1168_v14 }
 0x2cb   : > { %v1177_v19 = vmul.f32 1.0614054, %v1169_v15 }
 0x2cc   : > { %v1184_v8 = vadd.f32 -1.4531521, %v1176_v17 }
 0x2cd   : > { %v1185_v22 = vadd.f32 -1.4531521, %v1177_v19  ;;  %v2273_v19 = vmov 5  }
 0x2ce   : > { %v1192_v11 = vmul.f32 %v1184_v8, %v1168_v14  ;;  %v2274_v8 = vmov 3  }
 0x2cf   : > { %v1193_v25 = vmul.f32 %v1185_v22, %v1169_v15 }
 0x2d0   : > { %v1200_v26 = vadd.f32 1.4214138, %v1192_v11 }
 0x2d1   : > { %v1201_v27 = vadd.f32 1.4214138, %v1193_v25 }
 0x2d2   : > { %v1208_v21 = vmul.f32 %v1200_v26, %v1168_v14 }
 0x2d3   : > { %v1209_v28 = vmul.f32 %v1201_v27, %v1169_v15 }
 0x2d4   : > { %v1216_v24 = vadd.f32 -0.28449672, %v1208_v21 }
 0x2d5   : > { %v1217_v29 = vadd.f32 -0.28449672, %v1209_v28 }
 0x2d6   : > { %v1224_v30 = vmul.f32 %v1216_v24, %v1168_v14 }
 0x2d7   : > { %v1225_v40 = vmul.f32 %v1217_v29, %v1169_v15 }
 0x2d8   : > { %v1232_v31 = vadd.f32 0.2548296, %v1224_v30 }
 0x2d9   : > { %v1233_v32 = vadd.f32 0.2548296, %v1225_v40 }
 0x2da   : > { %v1240_v41 = vmul.f32 %v1232_v31, %v1168_v14 }
 0x2db   : > { %v1241_v34 = vmul.f32 %v1233_v32, %v1169_v15 }
 0x2dc   : > { %v1280_v35 = vmul.f32 %v2133_v33, %v1240_v41 }
 0x2dd   : > { %v1281_v36 = vmul.f32 %v2135_v39, %v1241_v34 }
 0x2de   : > { %v1288_v37 = vsub.f32 1.0, %v1280_v35 }
 0x2df   : > { %v1289_v49 = vsub.f32 1.0, %v1281_v36 }
 0x2e0   : > { %v1304_v42 = vsub.f32 0.0, %v1288_v37 }
 0x2e1   : > { %v1305_v43 = vsub.f32 0.0, %v1289_v49 }
 0x2e2   : > { %v1312_v47 = vsel %vm1296_vm7, %v1288_v37, %v1304_v42  ;;  %vm817_vm7 = vcmask 1031168  }
 0x2e3   : > { %v1320_v44 = vadd.f32 1.0, %v1312_v47  ;;  %v1313_v46 = vsel %vm1297_vm8, %v1289_v49, %v1305_v43 }
 0x2e4   : > { %v1321_v50 = vadd.f32 1.0, %v1313_v46 }
 0x2e5   : > { %v1328_v52 = vmul.f32 %v1320_v44, %v1104_v45 }
 0x2e6   : > { %v1329_v53 = vmul.f32 %v1321_v50, %v1105_v48  ;;  %v382_v48 = vlaneseq }
 0x2e8   : > { %1677 = vmatprep.subr.mxu1 %v1329_v53  ;;  %v2676_v54 = vand.u32 127, %v382_v48 }
 0x2e9   : > { %1678 = vmatpush1.msra.mxu1 %v1328_v52 }
 0x322   : > { %v356_v6 = vpop.permute.xlu1 %355 }
 0x323   : > { %372 = vst.msk [vmem:[#allocation2 + $0x10] sm:$0xff] %vm339_vm10, %v356_v6 }
 0x32a   : > { %v2645_v28 = vld [vmem:[#allocation2 + $0x10] sm:$0xff] }
 0x375   : > { %v1655_v56 = vpop.f32.mrb[10].mxu1 }
 0x376   : > { %v1917_v58 = vpop.f32.mrb[11].mxu1  ;;  %v1660_v57 = vsel %vm1659_vm9, %v1655_v56, -inf }
 0x377   : > { %1661 = vmax.xlane.f32.xlu0 %v1660_v57  ;;  %v2683_v58 = vadd.s32 128, %v2676_v54 }
 0x38d   : > { %353 = vrot.lane.b32.xlu0 %v345_v59, %s2268_s18 }
 0x391   : > { %357 = vrot.lane.b32.xlu0 %v347_v60, %s2268_s18 }
 0x395   : > { %359 = vrot.lane.b32.xlu0 %v348_v61, %s2268_s18  ;;  %v389_v61 = vand.u32 15, %v2676_v54  ;;  %s2196_s18 = sshll.u32 %s2281_s13, 4  ;;  %s2197_s18 = int_to_ptr.vmem [resolvable:$false] %s2196_s18 }
 0x397   : > { %vm413_vm13 = vcmp.lt.s32.totalorder %v389_v61, 15  ;;  %vm409_vm4 = vcmp.gt.s32.totalorder %v389_v61, 0 }
 0x399   : > { %550 = vperm.xlu0 %2093, %v2597_v62  }
 0x39d   : > { %2095 = vset.pattern.permute.xlu0 %v2269_v2 }
 0x39e   : > { %594 = vperm.xlu0 %2095, %v2603_v63  }
 0x3a2   : > { %2098 = vset.pattern.permute.xlu0 %v2270_v3 }
 0x3a3   : > { %739 = vperm.xlu0 %2098, %v2597_v62  }
 0x3a7   : > { %2100 = vset.pattern.permute.xlu0 %v2271_v4 }
 0x3a8   : > { %479 = vperm.xlu0 %2100, %v2603_v63  }
 0x3ac   : > { %2103 = vset.pattern.permute.xlu0 %v2272_v5 }
 0x3ad   : > { %536 = vperm.xlu0 %2103, %v2597_v62  }
 0x3b1   : > { %2111 = vset.pattern.permute.xlu0 %v2264_v1 }
 0x404   : > { %v1662_v7 = vpop.xlane.xlu0 %1661 }
 0x405   : > { %v1663_v9 = vsub.f32 %v1655_v56, %v1662_v7 }
 0x407   : > { %v1664_v10 = vmul.f32 1.442695, %v1663_v9 }
 0x408   : > { %v354_v12 = vpop.permute.xlu0 %353 }
 0x409   : > { %2136 = vpow2.f32 %v1664_v10  ;;  %370 = vst.msk [vmem:[#allocation2] sm:$0xff] %vm369_vm12, %v354_v12  ;;  %v2618_v13 = vsel %vm339_vm10, %v354_v12, %v356_v6  ;;  %v415_v6 = vsel %vm413_vm13, 1.0, %v2263_v0 }
 0x40c   : > { %v358_v14 = vpop.permute.xlu0 %357 }
 0x40d   : > { %373 = vst.msk [vmem:[#allocation2 + $0x18] sm:$0xff] %vm369_vm12, %v358_v14 }
 0x410   : > { %v360_v15 = vpop.permute.xlu0 %359  ;;  %v2637_v11 = vld [vmem:[#allocation2] sm:$0xff] }
 0x411   : > { %v2621_v16 = vsel %vm339_vm10, %v358_v14, %v360_v15  ;;  %375 = vst.msk [vmem:[#allocation2 + $0x28] sm:$0xff] %vm339_vm10, %v360_v15 }
 0x413   : > { %v2137_v17 = vpop.eup %2136 }
 0x414   : > { %v1666_v18 = vsel %vm1659_vm9, %v2137_v17, 0.0  ;;  %v2641_v27 = vld [vmem:[#allocation2 + $0x18] sm:$0xff] }
 0x415   : > { %1667 = vadd.xlane.f32.xlu1 %v1666_v18 }
 0x418   : > { %v551_v21 = vpop.permute.xlu0 %550  ;;  %v2649_v29 = vld [vmem:[#allocation2 + $0x28] sm:$0xff] }
 0x419   : > { %v557_v32 = vmul.f32 %v551_v21, %v2621_v16  ;;  %v558_v41 = vmul.f32 %v551_v21, %v2649_v29 }
 0x41d   : > { %v595_v45 = vpop.permute.xlu0 %594 }
 0x41e   : > { %v601_v44 = vmul.f32 %v595_v45, %v2637_v11  ;;  %v602_v46 = vmul.f32 %v595_v45, %v2618_v13  ;;  %v603_v52 = vmul.f32 %v595_v45, %v2645_v28 }
 0x426   : > { %546 = vperm.xlu1 %2092, %v2603_v63  }
 0x42a   : > { %2094 = vset.pattern.permute.xlu1 %v2273_v19 }
 0x42b   : > { %687 = vperm.xlu1 %2094, %v2603_v63  }
 0x42f   : > { %691 = vperm.xlu1 %2094, %v2597_v62  }
 0x433   : > { %2096 = vset.pattern.permute.xlu1 %v2269_v2  ;;  %v396_v2 = vand.u32 15, %v2683_v58 }
 0x434   : > { %598 = vperm.xlu1 %2096, %v2597_v62  }
 0x435   : > { %vm414_vm14 = vcmp.lt.s32.totalorder %v396_v2, 15  ;;  %vm410_vm6 = vcmp.gt.s32.totalorder %v396_v2, 0 }
 0x436   : > { %v416_v7 = vsel %vm414_vm14, 1.0, %v2263_v0 }
 0x437   : > { %v2105_v12 = vpack.i.bf16 %v416_v7, %v415_v6 }
 0x438   : > { %2097 = vset.pattern.permute.xlu1 %v2270_v3  ;;  %v740_v3 = vpop.permute.xlu0 %739 }
 0x439   : > { %735 = vperm.xlu1 %2097, %v2603_v63   ;;  %v746_v9 = vmul.f32 %v740_v3, %v2621_v16  ;;  %v747_v10 = vmul.f32 %v740_v3, %v2649_v29 }
 0x43d   : > { %2099 = vset.pattern.permute.xlu1 %v2274_v8 }
 0x43e   : > { %434 = vperm.xlu1 %2099, %v2603_v63  }
 0x442   : > { %438 = vperm.xlu1 %2099, %v2597_v62  }
 0x446   : > { %2101 = vset.pattern.permute.xlu1 %v2271_v4  ;;  %v745_v4 = vmul.f32 %v740_v3, %v2641_v27 }
 0x447   : > { %483 = vperm.xlu1 %2101, %v2597_v62  }
 0x44b   : > { %2102 = vset.pattern.permute.xlu1 %v2272_v5 }
 0x44c   : > { %532 = vperm.xlu1 %2102, %v2603_v63  }
 0x450   : > { %2104 = vset.pattern.permute.xlu1 %v2275_v20 }
 0x451   : > { %673 = vperm.xlu1 %2104, %v2603_v63  }
 0x455   : > { %677 = vperm.xlu1 %2104, %v2597_v62  }
 0x459   : > { %2110 = vset.pattern.permute.xlu1 %v2264_v1  ;;  %v556_v1 = vmul.f32 %v551_v21, %v2641_v27 }
 0x4a2   : > { %v1668_v22 = vpop.xlane.xlu1 %1667 }
 0x4a3   : > { %2138 = vrcp.f32 %v1668_v22 }
 0x4a6   : > { %v547_v23 = vpop.permute.xlu1 %546 }
 0x4a7   : > { %v553_v25 = vmul.f32 %v547_v23, %v2637_v11  ;;  %v554_v26 = vmul.f32 %v547_v23, %v2618_v13  ;;  %v555_v24 = vmul.f32 %v547_v23, %v2645_v28 }
 0x4a9   : > { %567 = vrot.lane.b32.xlu1 %v554_v26, %s2276_s19  ;;  %565 = vrot.lane.b32.xlu0 %v553_v25, %s2276_s19 }
 0x4aa   : > { %v688_v31 = vpop.permute.xlu1 %687 }
 0x4ab   : > { %v694_v39 = vmul.f32 %v688_v31, %v2637_v11  ;;  %v695_v35 = vmul.f32 %v688_v31, %v2618_v13  ;;  %v696_v49 = vmul.f32 %v688_v31, %v2645_v28  ;;  %v831_v31 = vld [vmem:[%s2967_s3 + $0x8] sm:$0xff] }
 0x4ad   : > { %v2139_v30 = vpop.eup %2138  ;;  %571 = vrot.lane.b32.xlu1 %v556_v1, %s2276_s19  ;;  %569 = vrot.lane.b32.xlu0 %v555_v24, %s2276_s19  ;;  %v830_v24 = vld [vmem:[%s2967_s3] sm:$0xff] }
 0x4ae   : > { %v1670_v40 = vmul.f32 %v2139_v30, %v1668_v22  ;;  %v692_v37 = vpop.permute.xlu1 %691 }
 0x4af   : > { %v697_v42 = vmul.f32 %v692_v37, %v2641_v27  ;;  %v698_v43 = vmul.f32 %v692_v37, %v2621_v16  ;;  %v699_v47 = vmul.f32 %v692_v37, %v2649_v29 }
 0x4b0   : > { %v1671_v33 = vsub.f32 2.0, %v1670_v40  ;;  %v977_v40 = vld [vmem:[%s2969_s5 + $0x18] sm:$0xff] }
 0x4b1   : > { %575 = vrot.lane.b32.xlu1 %v558_v41, %s2276_s19  ;;  %573 = vrot.lane.b32.xlu0 %v557_v32, %s2276_s19 }
 0x4b2   : > { %v1672_v34 = vmul.f32 %v2139_v30, %v1671_v33 }
 0x4b3   : > { %v599_v50 = vpop.permute.xlu1 %598 }
 0x4b4   : > { %v1673_v36 = vmul.f32 %v2137_v17, %v1672_v34  ;;  %v604_v53 = vmul.f32 %v599_v50, %v2641_v27  ;;  %v605_v55 = vmul.f32 %v599_v50, %v2621_v16  ;;  %v606_v56 = vmul.f32 %v599_v50, %v2649_v29 }
 0x4b5   : > { %708 = vrot.lane.b32.xlu1 %v695_v35, %s2276_s19  ;;  %706 = vrot.lane.b32.xlu0 %v694_v39, %s2276_s19 }
 0x4b6   : > { %1867 = vmatmul.mubr.msk.f32.vlgmr.msra.gmra.mrb[12].mxu1 %vm1659_vm9, %v1673_v36 }
 0x4b8   : > { %v736_v57 = vpop.permute.xlu1 %735 }
 0x4b9   : > { %712 = vrot.lane.b32.xlu1 %v697_v42, %s2276_s19  ;;  %710 = vrot.lane.b32.xlu0 %v696_v49, %s2276_s19  ;;  %v742_v59 = vmul.f32 %v736_v57, %v2637_v11  ;;  %v743_v60 = vmul.f32 %v736_v57, %v2618_v13  ;;  %v744_v5 = vmul.f32 %v736_v57, %v2645_v28 }
 0x4bd   : > { %716 = vrot.lane.b32.xlu1 %v699_v47, %s2276_s19  ;;  %714 = vrot.lane.b32.xlu0 %v698_v43, %s2276_s19  ;;  %v435_v14 = vpop.permute.xlu1 %434 }
 0x4be   : > { %v441_v15 = vmul.f32 %v435_v14, %v2637_v11  ;;  %v442_v17 = vmul.f32 %v435_v14, %v2618_v13  ;;  %v443_v18 = vmul.f32 %v435_v14, %v2645_v28 }
 0x4c1   : > { %615 = vrot.lane.b32.xlu1 %v602_v46, %s2277_s23  ;;  %613 = vrot.lane.b32.xlu0 %v601_v44, %s2277_s23  ;;  %v439_v19 = vpop.permute.xlu1 %438 }
 0x4c2   : > { %v444_v8 = vmul.f32 %v439_v19, %v2641_v27  ;;  %v446_v22 = vmul.f32 %v439_v19, %v2649_v29 }
 0x4c5   : > { %619 = vrot.lane.b32.xlu1 %v604_v53, %s2277_s23  ;;  %617 = vrot.lane.b32.xlu0 %v603_v52, %s2277_s23 }
 0x4c6   : > { %v484_v26 = vpop.permute.xlu1 %483 }
 0x4c7   : > { %v489_v21 = vmul.f32 %v484_v26, %v2641_v27  ;;  %v490_v1 = vmul.f32 %v484_v26, %v2621_v16  ;;  %v491_v30 = vmul.f32 %v484_v26, %v2649_v29 }
 0x4c9   : > { %623 = vrot.lane.b32.xlu1 %v606_v56, %s2277_s23  ;;  %621 = vrot.lane.b32.xlu0 %v605_v55, %s2277_s23 }
 0x4cb   : > { %v533_v32 = vpop.permute.xlu1 %532 }
 0x4cc   : > { %v539_v52 = vmul.f32 %v533_v32, %v2637_v11  ;;  %v541_v57 = vmul.f32 %v533_v32, %v2645_v28  ;;  %v540_v3 = vmul.f32 %v533_v32, %v2618_v13 }
 0x4cd   : > { %756 = vrot.lane.b32.xlu1 %v743_v60, %s2277_s23  ;;  %754 = vrot.lane.b32.xlu0 %v742_v59, %s2277_s23 }
 0x4d0   : > { %v2742_v41 = vpop.permute.xlu1 %673 }
 0x4d1   : > { %760 = vrot.lane.b32.xlu1 %v745_v4, %s2277_s23  ;;  %758 = vrot.lane.b32.xlu0 %v744_v5, %s2277_s23 }
 0x4d4   : > { %v2744_v34 = vpop.permute.xlu1 %677 }
 0x4d5   : > { %764 = vrot.lane.b32.xlu1 %v747_v10, %s2277_s23  ;;  %762 = vrot.lane.b32.xlu0 %v746_v9, %s2277_s23 }
 0x4d9   : > { %421 = vperm.xlu1 %2110, %v2603_v63   ;;  %2106 = vrot.lane.b32.xlu0 %v2105_v12, %s2278_s24  ;;  %v445_v63 = vmul.f32 %v439_v19, %v2621_v16 }
 0x4dd   : > { %426 = vperm.xlu0 %2111, %v2597_v62   ;;  %453 = vrot.lane.b32.xlu1 %v441_v15, %s2276_s19  ;;  %v480_v62 = vpop.permute.xlu0 %479 }
 0x4de   : > { %v486_v20 = vmul.f32 %v480_v62, %v2637_v11  ;;  %v487_v23 = vmul.f32 %v480_v62, %v2618_v13  ;;  %v488_v25 = vmul.f32 %v480_v62, %v2645_v28 }
 0x4e1   : > { %457 = vrot.lane.b32.xlu0 %v443_v18, %s2276_s19  ;;  %455 = vrot.lane.b32.xlu1 %v442_v17, %s2276_s19  ;;  %v537_v33 = vpop.permute.xlu0 %536 }
 0x4e2   : > { %v542_v17 = vmul.f32 %v537_v33, %v2641_v27  ;;  %v543_v18 = vmul.f32 %v537_v33, %v2621_v16 }
 0x4e5   : > { %461 = vrot.lane.b32.xlu0 %v445_v63, %s2276_s19  ;;  %459 = vrot.lane.b32.xlu1 %v444_v8, %s2276_s19 }
 0x4e9   : > { %498 = vrot.lane.b32.xlu0 %v486_v20, %s2277_s23  ;;  %463 = vrot.lane.b32.xlu1 %v446_v22, %s2276_s19  ;;  %s2839_s19 = scalar_lea.vmem [#allocation6], %s1856_s22 }
 0x4ea   : > { %s1764_s24 = sshll.u32 %s2839_s19, 4  ;;  %s2917_s24 = int_to_ptr.vmem [resolvable:$true] %s1764_s24 }
 0x4eb   : > { %s2192_s12 = scalar_lea.vmem %s2917_s24, 1024  ;;  %p2199_p2 = scmp.lt.s32.totalorder %s2917_s24, %s2197_s18 }
 0x4ec   : > { %p2193_p6 = scmp.ne.s32.totalorder %s2917_s24, %s2192_s12 }
 0x4ed   : > { %502 = vrot.lane.b32.xlu0 %v488_v25, %s2277_s23  ;;  %500 = vrot.lane.b32.xlu1 %v487_v23, %s2277_s23  ;;  %v544_v25 = vmul.f32 %v537_v33, %v2649_v29 }
 0x4ee   : > { %p2194_p10 = pnand %p2193_p6, %p2983_p9 }
 0x4f0   : > { %p2195_p12 = pneg %p2194_p10 }
 0x4f1   : > { %506 = vrot.lane.b32.xlu0 %v490_v1, %s2277_s23  ;;  %504 = vrot.lane.b32.xlu1 %v489_v21, %s2277_s23 }
 0x4f5   : > { %834 = vperm.xlu0 %2111, %v830_v24   ;;  %508 = vrot.lane.b32.xlu1 %v491_v30, %s2277_s23  ;;  %s1875_s23 = sshll.u32 %s2350_s9, 10  ;;  %s2923_s9 = scalar_lea.sflag [#allocation5], %s326_s17 }
 0x4f6   : > { %s2915_s10 = scalar_lea.hbm %s2972_s8, %s1875_s23 }
 0x4f9   : > { %995 = vperm.xlu0 %2111, %v977_v40   ;;  %839 = vperm.xlu1 %2110, %v831_v31  }
 0x51b   : > { %v568_v39 = vpop.permute.xlu1 %567  ;;  %v566_v35 = vpop.permute.xlu0 %565 }
 0x51c   : > { %v577_v50 = vsel %vm465_vm15, %v566_v35, %v568_v39  ;;  %v680_v35 = vmul.f32 %v2742_v41, %v2637_v11 }
 0x51d   : > { %v587_v53 = vadd.f32 %v577_v50, %v539_v52  ;;  %v682_v52 = vmul.f32 %v2742_v41, %v2645_v28 }
 0x51f   : > { %v572_v36 = vpop.permute.xlu1 %571  ;;  %v570_v37 = vpop.permute.xlu0 %569 }
 0x520   : > { %v578_v59 = vsel %vm465_vm15, %v568_v39, %v570_v37  ;;  %v589_v5 = vadd.f32 %v570_v37, %v541_v57  ;;  %v681_v37 = vmul.f32 %v2742_v41, %v2618_v13 }
 0x521   : > { %v588_v6 = vadd.f32 %v578_v59, %v540_v3  ;;  %v683_v59 = vmul.f32 %v2744_v34, %v2641_v27 }
 0x523   : > { %v576_v49 = vpop.permute.xlu1 %575  ;;  %v574_v42 = vpop.permute.xlu0 %573 }
 0x524   : > { %v579_v10 = vsel %vm465_vm15, %v572_v36, %v574_v42  ;;  %v580_v12 = vsel %vm465_vm15, %v574_v42, %v576_v49  ;;  %v592_v1 = vadd.f32 %v576_v49, %v544_v25 }
 0x525   : > { %v590_v8 = vadd.f32 %v579_v10, %v542_v17  ;;  %v591_v63 = vadd.f32 %v580_v12, %v543_v18 }
 0x527   : > { %v709_v43 = vpop.permute.xlu1 %708  ;;  %v707_v47 = vpop.permute.xlu0 %706 }
 0x528   : > { %v718_v32 = vsel %vm465_vm15, %v707_v47, %v709_v43 }
 0x529   : > { %v728_v42 = vadd.f32 %v718_v32, %v680_v35 }
 0x52b   : > { %v713_v45 = vpop.permute.xlu1 %712  ;;  %v2746_v44 = vpop.permute.xlu0 %710 }
 0x52c   : > { %v719_v36 = vsel %vm465_vm15, %v709_v43, %v2746_v44  ;;  %v730_v3 = vadd.f32 %v2746_v44, %v682_v52  ;;  %v685_v44 = vmul.f32 %v2744_v34, %v2649_v29 }
 0x52d   : > { %v729_v47 = vadd.f32 %v719_v36, %v681_v37 }
 0x52f   : > { %v2748_v46 = vpop.permute.xlu1 %716  ;;  %v2750_v48 = vpop.permute.xlu0 %714 }
 0x530   : > { %v721_v41 = vsel %vm465_vm15, %v2750_v48, %v2748_v46  ;;  %v733_v18 = vadd.f32 %v2748_v46, %v685_v44 }
 0x533   : > { %v616_v55 = vpop.permute.xlu1 %615  ;;  %v614_v56 = vpop.permute.xlu0 %613 }
 0x534   : > { %v625_v60 = vsel %vm510_vm0, %v614_v56, %v616_v55 }
 0x535   : > { %v635_v4 = vadd.f32 %v625_v60, %v587_v53 }
 0x537   : > { %v620_v7 = vpop.permute.xlu1 %619  ;;  %v618_v9 = vpop.permute.xlu0 %617  ;;  %647 = vrot.lane.b32.xlu1 %v635_v4, %s2279_s20 }
 0x538   : > { %v626_v14 = vsel %vm510_vm0, %v616_v55, %v618_v9  ;;  %v637_v15 = vadd.f32 %v618_v9, %v589_v5  ;;  %v720_v55 = vsel %vm465_vm15, %v713_v45, %v2750_v48  ;;  %v684_v9 = vmul.f32 %v2744_v34, %v2621_v16 }
 0x539   : > { %v636_v19 = vadd.f32 %v626_v14, %v588_v6 }
 0x53b   : > { %v624_v62 = vpop.permute.xlu1 %623  ;;  %v622_v20 = vpop.permute.xlu0 %621  ;;  %649 = vrot.lane.b32.xlu0 %v636_v19, %s2279_s20  ;;  %651 = vrot.lane.b32.xlu1 %v637_v15, %s2279_s20  ;;  %v732_v15 = vadd.f32 %v721_v41, %v684_v9 }
 0x53c   : > { %v627_v22 = vsel %vm510_vm0, %v620_v7, %v622_v20  ;;  %v628_v23 = vsel %vm510_vm0, %v622_v20, %v624_v62  ;;  %v640_v30 = vadd.f32 %v624_v62, %v592_v1  ;;  %v731_v7 = vadd.f32 %v720_v55, %v683_v59 }
 0x53d   : > { %v638_v26 = vadd.f32 %v627_v22, %v590_v8  ;;  %v639_v21 = vadd.f32 %v628_v23, %v591_v63 }
 0x53f   : > { %v755_v24 = vpop.permute.xlu0 %754  ;;  %653 = vrot.lane.b32.xlu0 %v638_v26, %s2279_s20  ;;  %655 = vrot.lane.b32.xlu1 %v639_v21, %s2279_s20  ;;  %v757_v40 = vpop.permute.xlu1 %756 }
 0x540   : > { %v766_v49 = vsel %vm510_vm0, %v755_v24, %v757_v40 }
 0x541   : > { %v776_v56 = vadd.f32 %v766_v49, %v728_v42 }
 0x543   : > { %v759_v31 = vpop.permute.xlu0 %758  ;;  %657 = vrot.lane.b32.xlu0 %v640_v30, %s2279_s20  ;;  %v761_v33 = vpop.permute.xlu1 %760  ;;  %s2198_s20 = scalar_lea.vmem %s2197_s18, 2048 }
 0x544   : > { %v767_v50 = vsel %vm510_vm0, %v757_v40, %v759_v31  ;;  %v778_v10 = vadd.f32 %v759_v31, %v730_v3  ;;  %p2200_p3 = scmp.lt.s32.totalorder %s2198_s20, %s2192_s12 }
 0x545   : > { %v777_v60 = vadd.f32 %v767_v50, %v729_v47 }
 0x546   : > { %p2201_p4 = por %p2200_p3, %p2199_p2 }
 0x547   : > { %v763_v39 = vpop.permute.xlu0 %762  ;;  %v765_v4 = vpop.permute.xlu1 %764 }
 0x548   : > { %v768_v5 = vsel %vm510_vm0, %v761_v33, %v763_v39  ;;  %v769_v12 = vsel %vm510_vm0, %v763_v39, %v765_v4  ;;  %v781_v8 = vadd.f32 %v765_v4, %v733_v18  ;;  %p2202_p7 = pnand %p2201_p4, %p2195_p12 }
 0x549   : > { %v779_v14 = vadd.f32 %v768_v5, %v731_v7  ;;  %v780_v19 = vadd.f32 %v769_v12, %v732_v15 }
 0x54b   : > { %v2107_v53 = vpop.permute.xlu0 %2106 }
 0x54c   : > { %v2109_v43 = vunpack.i.h.bf16 %v2107_v53  ;;  %v2108_v57 = vunpack.i.l.bf16 %v2107_v53 }
 0x54e   : > { %v793_v6 = vmul.f32 %v2108_v57, %v776_v56  ;;  %v789_v28 = vsel %vm788_vm1, %v2108_v57, %v2109_v43  ;;  %v795_v17 = vmul.f32 %v2109_v43, %v778_v10  ;;  %v796_v48 = vmul.f32 %v2108_v57, %v779_v14 }
 0x54f   : > { %v794_v45 = vmul.f32 %v789_v28, %v777_v60  ;;  %v797_v63 = vmul.f32 %v789_v28, %v780_v19  ;;  %v798_v62 = vmul.f32 %v2109_v43, %v781_v8 }
 0x550   : > { %805 = vrot.lane.b32.xlu1 %v793_v6, %s2280_s21 }
 0x551   : > { %807 = vrot.lane.b32.xlu0 %v794_v45, %s2280_s21 }
 0x554   : > { %809 = vrot.lane.b32.xlu1 %v795_v17, %s2280_s21 }
 0x555   : > { %811 = vrot.lane.b32.xlu0 %v796_v48, %s2280_s21 }
 0x558   : > { %v2792_v20 = vpop.permute.xlu1 %421  ;;  %813 = vrot.lane.b32.xlu1 %v797_v63, %s2280_s21 }
 0x559   : > { %815 = vrot.lane.b32.xlu0 %v798_v62, %s2280_s21  ;;  %v430_v39 = vmul.f32 %v2792_v20, %v2618_v13 }
 0x55c   : > { %v427_v29 = vpop.permute.xlu0 %426  ;;  %v2794_v34 = vpop.permute.xlu1 %453 }
 0x55d   : > { %v431_v25 = vmul.f32 %v427_v29, %v2641_v27  ;;  %v432_v24 = vmul.f32 %v427_v29, %v2621_v16 }
 0x560   : > { %v458_v22 = vpop.permute.xlu0 %457  ;;  %v2796_v23 = vpop.permute.xlu1 %455 }
 0x561   : > { %v467_v31 = vsel %vm465_vm15, %v2796_v23, %v458_v22 }
 0x562   : > { %v475_v27 = vadd.f32 %v467_v31, %v430_v39 }
 0x564   : > { %v462_v46 = vpop.permute.xlu0 %461  ;;  %v460_v26 = vpop.permute.xlu1 %459 }
 0x565   : > { %v468_v21 = vsel %vm465_vm15, %v460_v26, %v462_v46 }
 0x566   : > { %v476_v1 = vadd.f32 %v468_v21, %v431_v25 }
 0x568   : > { %v2801_v30 = vpop.permute.xlu0 %498  ;;  %v464_v40 = vpop.permute.xlu1 %463 }
 0x569   : > { %v469_v32 = vsel %vm465_vm15, %v462_v46, %v464_v40 }
 0x56a   : > { %v477_v35 = vadd.f32 %v469_v32, %v432_v24 }
 0x56c   : > { %v503_v36 = vpop.permute.xlu0 %502  ;;  %v2808_v33 = vpop.permute.xlu1 %500 }
 0x56d   : > { %v512_v37 = vsel %vm510_vm0, %v2808_v33, %v503_v36 }
 0x56e   : > { %v2812_v16 = vadd.f32 %v512_v37, %v475_v27 }
 0x570   : > { %v507_v49 = vpop.permute.xlu0 %506  ;;  %v505_v42 = vpop.permute.xlu1 %504 }
 0x571   : > { %v513_v50 = vsel %vm510_vm0, %v505_v42, %v507_v49 }
 0x572   : > { %v2815_v52 = vadd.f32 %v513_v50, %v476_v1 }
 0x574   : > { %v2817_v47 = vpop.permute.xlu0 %834  ;;  %v509_v13 = vpop.permute.xlu1 %508 }
 0x575   : > { %v514_v53 = vsel %vm510_vm0, %v507_v49, %v509_v13 }
 0x576   : > { %v2820_v55 = vadd.f32 %v514_v53, %v477_v35 }
 0x578   : > { %v996_v56 = vpop.permute.xlu0 %995 }
 0x579   : > { %v2823_v43 = vadd.f32 %v2579_v38, %v996_v56  ;;  %v2826_v57 = vadd.f32 %v2581_v51, %v996_v56 }
 0x57b   : > { %v2829_v59 = vmul.f32 0.70710677, %v2823_v43  ;;  %v2832_v60 = vmul.f32 0.70710677, %v2826_v57 }
 0x57d   : > { %v1122_v3 = vand.u32 2147483647, %v2829_v59  ;;  %v1123_v4 = vand.u32 2147483647, %v2832_v60  ;;  %vm1298_vm2 = vcmp.ge.f32.partialorder %v2829_v59, 0.0  ;;  %vm1299_vm3 = vcmp.ge.f32.partialorder %v2832_v60, 0.0 }
 0x57e   : > { %v466_v59 = vsel %vm465_vm15, %v2794_v34, %v2796_v23 }
 0x57f   : > { %v1130_v5 = vmul.f32 0.3275911, %v1122_v3  ;;  %v1131_v6 = vmul.f32 0.3275911, %v1123_v4  ;;  %v1250_v44 = vsub.f32 0.0, %v1122_v3  ;;  %v1251_v14 = vsub.f32 0.0, %v1123_v4 }
 0x581   : > { %v1138_v28 = vadd.f32 1.0, %v1130_v5  ;;  %v1139_v41 = vadd.f32 1.0, %v1131_v6  ;;  %v1258_v48 = vmul.f32 %v1250_v44, %v1122_v3  ;;  %v1259_v8 = vmul.f32 %v1251_v14, %v1123_v4 }
 0x583   : > { %2140 = vrcp.f32 %v1138_v28  ;;  %v1272_v22 = vmul.f32 1.442695, %v1258_v48  ;;  %v1274_v46 = vmul.f32 1.442695, %v1259_v8  ;;  %v412_v48 = vsel %vm410_vm6, 1.0, %v2263_v0 }
 0x584   : > { %2142 = vrcp.f32 %v1139_v41 }
 0x585   : > { %2144 = vpow2.f32 %v1272_v22 }
 0x586   : > { %2146 = vpow2.f32 %v1274_v46 }
 0x589   : > { %v1743_v38 = vpop.f32.mrb[12].mxu1 }
 0x58a   : > { %1748 = vst [vmem:[%s2839_s19 + $0x30] sm:$0xff] %v1743_v38  ;;  %v1745_v51 = vpop.f32.mrb[13].mxu1 }
 0x58b   : > { %1749 = vst [vmem:[%s2839_s19 + $0x38] sm:$0xff] %v1745_v51  ;;  %v1107_v51 = vmul.f32 0.5, %v2826_v57  ;;  %v511_v57 = vsel %vm510_vm0, %v2801_v30, %v2808_v33 }
 0x58d   : > { %v2141_v7 = vpop.eup %2140 }
 0x58e   : > { %v2143_v45 = vpop.eup %2142  ;;  %v1154_v9 = vmul.f32 %v2141_v7, %v1138_v28  ;;  %v1106_v28 = vmul.f32 0.5, %v2823_v43  ;;  %v429_v43 = vmul.f32 %v2792_v20, %v2637_v11 }
 0x58f   : > { %v1155_v10 = vmul.f32 %v2143_v45, %v1139_v41  ;;  %v2145_v49 = vpop.eup %2144 }
 0x590   : > { %v1162_v12 = vsub.f32 2.0, %v1154_v9  ;;  %v2147_v50 = vpop.eup %2146 }
 0x591   : > { %v1163_v15 = vsub.f32 2.0, %v1155_v10 }
 0x592   : > { %v1170_v17 = vmul.f32 %v2141_v7, %v1162_v12 }
 0x593   : > { %v1171_v18 = vmul.f32 %v2143_v45, %v1163_v15  ;;  %v840_v45 = vpop.permute.xlu1 %839  ;;  %v474_v15 = vadd.f32 %v466_v59, %v429_v43 }
 0x594   : > { %v1178_v19 = vmul.f32 1.0614054, %v1170_v17 }
 0x595   : > { %v1179_v63 = vmul.f32 1.0614054, %v1171_v18 }
 0x596   : > { %v1186_v62 = vadd.f32 -1.4531521, %v1178_v19  ;;  %v524_v19 = vmul.f32 %v2812_v16, %v412_v48  ;;  %v526_v16 = vmul.f32 %v2820_v55, %v412_v48 }
 0x597   : > { %v1187_v29 = vadd.f32 -1.4531521, %v1179_v63 }
 0x598   : > { %v1194_v25 = vmul.f32 %v1186_v62, %v1170_v17 }
 0x599   : > { %v1195_v26 = vmul.f32 %v1187_v29, %v1171_v18 }
 0x59a   : > { %v1202_v21 = vadd.f32 1.4214138, %v1194_v25 }
 0x59b   : > { %v1203_v1 = vadd.f32 1.4214138, %v1195_v26 }
 0x59c   : > { %v1210_v24 = vmul.f32 %v1202_v21, %v1170_v17 }
 0x59d   : > { %v1211_v40 = vmul.f32 %v1203_v1, %v1171_v18 }
 0x59e   : > { %v1218_v31 = vadd.f32 -0.28449672, %v1210_v24 }
 0x59f   : > { %v1219_v32 = vadd.f32 -0.28449672, %v1211_v40 }
 0x5a0   : > { %v1226_v39 = vmul.f32 %v1218_v31, %v1170_v17 }
 0x5a1   : > { %v1227_v35 = vmul.f32 %v1219_v32, %v1171_v18 }
 0x5a2   : > { %v1234_v27 = vadd.f32 0.2548296, %v1226_v39 }
 0x5a3   : > { %v1235_v36 = vadd.f32 0.2548296, %v1227_v35 }
 0x5a4   : > { %v1242_v37 = vmul.f32 %v1234_v27, %v1170_v17  ;;  %v519_v17 = vadd.f32 %v511_v57, %v474_v15 }
 0x5a5   : > { %v1243_v42 = vmul.f32 %v1235_v36, %v1171_v18  ;;  %v411_v18 = vsel %vm409_vm4, 1.0, %v2263_v0 }
 0x5a6   : > { %v1282_v13 = vmul.f32 %v2145_v49, %v1242_v37  ;;  %v523_v20 = vmul.f32 %v519_v17, %v411_v18  ;;  %v525_v25 = vmul.f32 %v2815_v52, %v411_v18 }
 0x5a7   : > { %v1283_v53 = vmul.f32 %v2147_v50, %v1243_v42 }
 0x5a8   : > { %v1290_v56 = vsub.f32 1.0, %v1282_v13 }
 0x5a9   : > { %v1291_v3 = vsub.f32 1.0, %v1283_v53  ;;  %v648_v44 = vpop.permute.xlu1 %647 }
 0x5aa   : > { %v1306_v4 = vsub.f32 0.0, %v1290_v56 }
 0x5ab   : > { %v1307_v5 = vsub.f32 0.0, %v1291_v3 }
 0x5ac   : > { %v1314_v6 = vsel %vm1298_vm2, %v1290_v56, %v1306_v4 }
 0x5ad   : > { %v1315_v41 = vsel %vm1299_vm3, %v1291_v3, %v1307_v5  ;;  %v1322_v38 = vadd.f32 1.0, %v1314_v6  ;;  %v650_v12 = vpop.permute.xlu0 %649  ;;  %v652_v60 = vpop.permute.xlu1 %651 }
 0x5ae   : > { %v1323_v7 = vadd.f32 1.0, %v1315_v41  ;;  %v660_v11 = vsel %vm659_vm5, %v648_v44, %v650_v12  ;;  %v661_v54 = vsel %vm659_vm5, %v650_v12, %v652_v60 }
 0x5af   : > { %v1330_v9 = vmul.f32 %v1322_v38, %v1106_v28  ;;  %v668_v33 = vadd.f32 %v660_v11, %v523_v20  ;;  %v669_v58 = vadd.f32 %v661_v54, %v524_v19 }
 0x5b0   : > { %v1331_v10 = vmul.f32 %v1323_v7, %v1107_v51 }
 0x5b1   : > { %1428 = vst [vmem:[%s2839_s19 + $0x20] sm:$0xff] %v1330_v9  ;;  %v654_v14 = vpop.permute.xlu0 %653  ;;  %v656_v34 = vpop.permute.xlu1 %655 }
 0x5b2   : > { %1429 = vst [vmem:[%s2839_s19 + $0x28] sm:$0xff] %v1331_v10  ;;  %v662_v62 = vsel %vm659_vm5, %v654_v14, %v656_v34 }
 0x5b3   : > { %v670_v1 = vadd.f32 %v662_v62, %v525_v25 }
 0x5b5   : > { %v658_v23 = vpop.permute.xlu0 %657 }
 0x5b6   : > { %v663_v46 = vsel %vm659_vm5, %v656_v34, %v658_v23 }
 0x5b7   : > { %v671_v31 = vadd.f32 %v663_v46, %v526_v16 }
 0x5c2   : > { %v806_v30 = vpop.permute.xlu1 %805 }
 0x5c3   : > { %v808_v61 = vpop.permute.xlu0 %807 }
 0x5c4   : > { %v818_v8 = vsel %vm817_vm7, %v806_v30, %v808_v61 }
 0x5c5   : > { %v826_v63 = vadd.f32 %v818_v8, %v668_v33 }
 0x5c6   : > { %v810_v2 = vpop.permute.xlu1 %809 }
 0x5c7   : > { %v2869_v29 = vadd.f32 %v2817_v47, %v826_v63  ;;  %v819_v0 = vsel %vm817_vm7, %v808_v61, %v810_v2  ;;  %v812_v22 = vpop.permute.xlu0 %811 }
 0x5c8   : > { %v827_v26 = vadd.f32 %v819_v0, %v669_v58 }
 0x5c9   : > { %v2876_v21 = vmul.f32 0.70710677, %v2869_v29 }
 0x5ca   : > { %v2879_v24 = vadd.f32 %v2817_v47, %v827_v26  ;;  %v814_v40 = vpop.permute.xlu1 %813 }
 0x5cb   : > { %v854_v32 = vand.u32 2147483647, %v2876_v21  ;;  %v820_v39 = vsel %vm817_vm7, %v812_v22, %v814_v40  ;;  %v816_v35 = vpop.permute.xlu0 %815  ;;  %vm942_vm8 = vcmp.ge.f32.partialorder %v2876_v21, 0.0 }
 0x5cc   : > { %v2884_v52 = vmul.f32 0.70710677, %v2879_v24  ;;  %v828_v27 = vadd.f32 %v820_v39, %v670_v1  ;;  %v821_v55 = vsel %vm817_vm7, %v814_v40, %v816_v35 }
 0x5cd   : > { %v858_v36 = vmul.f32 0.3275911, %v854_v32  ;;  %v829_v37 = vadd.f32 %v821_v55, %v671_v31 }
 0x5ce   : > { %v855_v49 = vand.u32 2147483647, %v2884_v52  ;;  %v2888_v42 = vadd.f32 %v840_v45, %v828_v27  ;;  %vm943_vm9 = vcmp.ge.f32.partialorder %v2884_v52, 0.0 }
 0x5cf   : > { %v862_v47 = vadd.f32 1.0, %v858_v36  ;;  %v2890_v50 = vadd.f32 %v840_v45, %v829_v37  ;;  %v918_v45 = vsub.f32 0.0, %v854_v32 }
 0x5d0   : > { %v859_v13 = vmul.f32 0.3275911, %v855_v49  ;;  %v2893_v53 = vmul.f32 0.70710677, %v2888_v42  ;;  %v919_v59 = vsub.f32 0.0, %v855_v49 }
 0x5d1   : > { %2148 = vrcp.f32 %v862_v47  ;;  %v2896_v56 = vmul.f32 0.70710677, %v2890_v50  ;;  %v922_v60 = vmul.f32 %v918_v45, %v854_v32 }
 0x5d2   : > { %v863_v3 = vadd.f32 1.0, %v859_v13  ;;  %v856_v4 = vand.u32 2147483647, %v2893_v53  ;;  %v923_v23 = vmul.f32 %v919_v59, %v855_v49  ;;  %vm944_vm10 = vcmp.ge.f32.partialorder %v2893_v53, 0.0 }
 0x5d3   : > { %v857_v5 = vand.u32 2147483647, %v2896_v56  ;;  %v926_v48 = vmul.f32 1.442695, %v922_v60  ;;  %vm945_vm11 = vcmp.ge.f32.partialorder %v2896_v56, 0.0 }
 0x5d4   : > { %2150 = vrcp.f32 %v863_v3  ;;  %v860_v6 = vmul.f32 0.3275911, %v856_v4  ;;  %v920_v11 = vsub.f32 0.0, %v856_v4  ;;  %v928_v2 = vmul.f32 1.442695, %v923_v23 }
 0x5d5   : > { %v861_v28 = vmul.f32 0.3275911, %v857_v5  ;;  %v921_v54 = vsub.f32 0.0, %v857_v5 }
 0x5d6   : > { %v864_v41 = vadd.f32 1.0, %v860_v6  ;;  %v924_v62 = vmul.f32 %v920_v11, %v856_v4 }
 0x5d7   : > { %v865_v38 = vadd.f32 1.0, %v861_v28  ;;  %v925_v46 = vmul.f32 %v921_v54, %v857_v5 }
 0x5d8   : > { %2152 = vrcp.f32 %v864_v41  ;;  %v930_v32 = vmul.f32 1.442695, %v924_v62 }
 0x5d9   : > { %2154 = vrcp.f32 %v865_v38  ;;  %v932_v55 = vmul.f32 1.442695, %v925_v46 }
 0x5da   : > { %2156 = vpow2.f32 %v926_v48  ;;  %v846_v48 = vmul.f32 0.5, %v2869_v29 }
 0x5db   : > { %v2149_v51 = vpop.eup %2148  ;;  %2158 = vpow2.f32 %v928_v2 }
 0x5dc   : > { %v870_v7 = vmul.f32 %v2149_v51, %v862_v47  ;;  %2160 = vpow2.f32 %v930_v32 }
 0x5dd   : > { %2162 = vpow2.f32 %v932_v55 }
 0x5de   : > { %v2151_v9 = vpop.eup %2150  ;;  %v874_v10 = vsub.f32 2.0, %v870_v7 }
 0x5df   : > { %v871_v44 = vmul.f32 %v2151_v9, %v863_v3 }
 0x5e0   : > { %v878_v12 = vmul.f32 %v2149_v51, %v874_v10 }
 0x5e1   : > { %v875_v43 = vsub.f32 2.0, %v871_v44 }
 0x5e2   : > { %v2153_v14 = vpop.eup %2152  ;;  %v882_v57 = vmul.f32 1.0614054, %v878_v12 }
 0x5e3   : > { %v2155_v15 = vpop.eup %2154  ;;  %v879_v17 = vmul.f32 %v2151_v9, %v875_v43  ;;  %v872_v18 = vmul.f32 %v2153_v14, %v864_v41 }
 0x5e4   : > { %v886_v34 = vadd.f32 -1.4531521, %v882_v57  ;;  %v873_v20 = vmul.f32 %v2155_v15, %v865_v38  ;;  %v2157_v41 = vpop.eup %2156 }
 0x5e5   : > { %v883_v30 = vmul.f32 1.0614054, %v879_v17  ;;  %v876_v33 = vsub.f32 2.0, %v872_v18  ;;  %v2159_v44 = vpop.eup %2158 }
 0x5e6   : > { %v890_v61 = vmul.f32 %v886_v34, %v878_v12  ;;  %v877_v19 = vsub.f32 2.0, %v873_v20 }
 0x5e7   : > { %v887_v8 = vadd.f32 -1.4531521, %v883_v30  ;;  %v880_v63 = vmul.f32 %v2153_v14, %v876_v33 }
 0x5e8   : > { %v894_v58 = vadd.f32 1.4214138, %v890_v61  ;;  %v881_v0 = vmul.f32 %v2155_v15, %v877_v19 }
 0x5e9   : > { %v891_v22 = vmul.f32 %v887_v8, %v879_v17  ;;  %v884_v25 = vmul.f32 1.0614054, %v880_v63  ;;  %v847_v8 = vmul.f32 0.5, %v2879_v24  ;;  %v848_v24 = vmul.f32 0.5, %v2888_v42 }
 0x5ea   : > { %v898_v26 = vmul.f32 %v894_v58, %v878_v12  ;;  %v885_v16 = vmul.f32 1.0614054, %v881_v0 }
 0x5eb   : > { %v895_v1 = vadd.f32 1.4214138, %v891_v22  ;;  %v888_v40 = vadd.f32 -1.4531521, %v884_v25  ;;  %v849_v25 = vmul.f32 0.5, %v2890_v50 }
 0x5ec   : > { %v902_v31 = vadd.f32 -0.28449672, %v898_v26  ;;  %v889_v39 = vadd.f32 -1.4531521, %v885_v16 }
 0x5ed   : > { %v899_v35 = vmul.f32 %v895_v1, %v879_v17  ;;  %v892_v27 = vmul.f32 %v888_v40, %v880_v63 }
 0x5ee   : > { %v906_v36 = vmul.f32 %v902_v31, %v878_v12  ;;  %v893_v37 = vmul.f32 %v889_v39, %v881_v0 }
 0x5ef   : > { %v903_v49 = vadd.f32 -0.28449672, %v899_v35  ;;  %v896_v47 = vadd.f32 1.4214138, %v892_v27 }
 0x5f0   : > { %v910_v13 = vadd.f32 0.2548296, %v906_v36  ;;  %v897_v3 = vadd.f32 1.4214138, %v893_v37 }
 0x5f1   : > { %v907_v4 = vmul.f32 %v903_v49, %v879_v17  ;;  %v900_v5 = vmul.f32 %v896_v47, %v880_v63 }
 0x5f2   : > { %v914_v6 = vmul.f32 %v910_v13, %v878_v12  ;;  %v901_v28 = vmul.f32 %v897_v3, %v881_v0  ;;  %v2161_v12 = vpop.eup %2160 }
 0x5f3   : > { %v911_v38 = vadd.f32 0.2548296, %v907_v4  ;;  %v904_v51 = vadd.f32 -0.28449672, %v900_v5  ;;  %v2163_v20 = vpop.eup %2162 }
 0x5f4   : > { %v934_v7 = vmul.f32 %v2157_v41, %v914_v6  ;;  %v905_v45 = vadd.f32 -0.28449672, %v901_v28 }
 0x5f5   : > { %v915_v9 = vmul.f32 %v911_v38, %v879_v17  ;;  %v908_v10 = vmul.f32 %v904_v51, %v880_v63 }
 0x5f6   : > { %v938_v59 = vsub.f32 1.0, %v934_v7  ;;  %v909_v60 = vmul.f32 %v905_v45, %v881_v0 }
 0x5f7   : > { %v935_v43 = vmul.f32 %v2159_v44, %v915_v9  ;;  %v912_v14 = vadd.f32 0.2548296, %v908_v10 }
 0x5f8   : > { %v946_v57 = vsub.f32 0.0, %v938_v59  ;;  %v913_v15 = vadd.f32 0.2548296, %v909_v60 }
 0x5f9   : > { %v939_v18 = vsub.f32 1.0, %v935_v43  ;;  %v916_v34 = vmul.f32 %v912_v14, %v880_v63 }
 0x5fa   : > { %v950_v23 = vsel %vm942_vm8, %v938_v59, %v946_v57  ;;  %v917_v11 = vmul.f32 %v913_v15, %v881_v0 }
 0x5fb   : > { %v954_v17 = vadd.f32 1.0, %v950_v23  ;;  %v947_v30 = vsub.f32 0.0, %v939_v18  ;;  %v936_v33 = vmul.f32 %v2161_v12, %v916_v34 }
 0x5fc   : > { %v937_v54 = vmul.f32 %v2163_v20, %v917_v11 }
 0x5fd   : > { %v958_v61 = vmul.f32 %v954_v17, %v846_v48  ;;  %v951_v21 = vsel %vm943_vm9, %v939_v18, %v947_v30  ;;  %v940_v19 = vsub.f32 1.0, %v936_v33 }
 0x5fe   : > { %v955_v63 = vadd.f32 1.0, %v951_v21  ;;  %v941_v58 = vsub.f32 1.0, %v937_v54 }
 0x5ff   : > { %962 = vst [vmem:[%s2839_s19] sm:$0xff] %v958_v61  ;;  %v948_v2 = vsub.f32 0.0, %v940_v19 }
 0x600   : > { %v959_v62 = vmul.f32 %v955_v63, %v847_v8  ;;  %v949_v29 = vsub.f32 0.0, %v941_v58 }
 0x601   : > { %v952_v0 = vsel %vm944_vm10, %v940_v19, %v948_v2 }
 0x602   : > { %963 = vst [vmem:[%s2839_s19 + $0x8] sm:$0xff] %v959_v62  ;;  %v956_v52 = vadd.f32 1.0, %v952_v0  ;;  %v953_v22 = vsel %vm945_vm11, %v941_v58, %v949_v29 }
 0x603   : > { %v957_v46 = vadd.f32 1.0, %v953_v22 }
 0x604   : > { %v960_v26 = vmul.f32 %v956_v52, %v848_v24 }
 0x605   : > { %v961_v53 = vmul.f32 %v957_v46, %v849_v25 }
 0x606   : > { %964 = vst [vmem:[%s2839_s19 + $0x10] sm:$0xff] %v960_v26 }
 0x607   : > { %965 = vst [vmem:[%s2839_s19 + $0x18] sm:$0xff] %v961_v53 }
 0x608   : > { %2205 = shalt.err (!%p2202_p7)
}
 0x609   : > { %s2206_s21 = scalar_lea.hbm %s2915_s10, 1024  ;;  %s2210_s19 = scalar_lea.hbm %s2972_s8, 2048 }
 0x60a   : > { %p2207_p8 = scmp.ne.s32.totalorder %s2915_s10, %s2206_s21  ;;  %p2211_p1 = scmp.lt.u32.totalorder %s2915_s10, %s2972_s8 }
 0x60b   : > { %p2212_p0 = scmp.lt.u32.totalorder %s2210_s19, %s2206_s21  ;;  %p2214_p6 = scmp.lt.u32.totalorder %s2206_s21, %s2915_s10 }
 0x60c   : > { %p2208_p11 = pnand %p2207_p8, %p2983_p9 }
 0x60d   : > { %p2213_p5 = por %p2212_p0, %p2211_p1 }
 0x60e   : > { %p2209_p13 = pneg %p2208_p11 }
 0x60f   : > { %p2215_p10 = por %p2214_p6, %p2213_p5 }
 0x611   : > { %p2216_p12 = pnand %p2215_p10, %p2209_p13 }
 0x613   : > { %2219 = shalt.err (!%p2216_p12)
}
 0x614   : > { %s2282_s26 = smov 256   ;;  %s2283_s12 = smov 16  }
 0x615   : > { %2022 = dma.vmem_to_hbm [thread:$0]  (%p2983_p9), %s2917_s24, 1024, %s2915_s10, %s2923_s9, %s2282_s26, %s2282_s26, %s2283_s12  }
 0x616 PF: > { %p2034_p2 = scmp.ge.s32.totalorder %s2258_s30, 2  ;;  %s1779_s13 = sand.u32 1, %s2246_s27  }
 0x617   : > { %p2984_p3 = scmp.ne.s32.totalorder %s2977_s16, 0  ;;  %s1780_s18 = scalar_lea.sflag [#allocation5], %s1779_s13 }
 0x619   : > { %p2029_p4 = pnand %p2034_p2, %p2984_p3 }
 0x61b   : > { %2241 = dma.done.wait (!%p2029_p4), %s1780_s18, 1024  }
 0x61c   : > { %2243 = vsyncadd (!%p2029_p4), %s1780_s18, 4294966272  ;;  %p19_p7 = scmp.ge.s32.totalorder %s2354_s11, 4   ;;  %s2985_s27 = smov %s2250_s28 }
 0x61d   : > { %s2986_s28 = smov %s2254_s29  ;;  %s2987_s29 = smov %s2365_s14 }
 0x61e   : > { %s2988_s30 = smov %s2354_s11  ;;  %21 = sbr.rel (!%p19_p7) target bundleno = 4 (0x4), region = 95 }
 0x625   :  { %1785 = vsyncpa [#allocation4], 1 }
 0x626   :  { %1787 = vsyncpa [#allocation4 + $0x1], 1 }
 0x627   :  { %1788 = vsyncpa [#allocation5], 1 }
 0x628   :  { %1790 = vsyncpa [#allocation5 + $0x1], 1 }

</bundles_post_ra>
